<compile_context>
chip_gen: v5e
topology: v5e:2x2
jax: 0.10.0
libtpu: 0.0.40
codegen_flags: <defaults>
</compile_context>

<pallas_src>
import functools

import jax
import jax.numpy as jnp
from jax.experimental import pallas as pl
from jax.experimental.pallas import tpu as pltpu


# ----------------------------------------------------------------------------
# Fused kernel: one grid step = one batch element x one tile of tp2 frames.
# ----------------------------------------------------------------------------
def _fused_kernel(xc_ref, halo_ref, w1_ref, b1_ref, w2_ref, b2_ref, o_ref, *,
                  tp2, n_frames):
    # xc_ref  : (1, 1, tp2, 128)  raw blocks j0 .. j0+tp2-1 (128 samples each)
    # halo_ref: (1, 1, 6, 128)    rows 0..2 = raw blocks j0-3..j0-1 (zeros at edge)
    #                             rows 3..5 = raw blocks j0+tp2..j0+tp2+2
    # w1_ref  : (3, 128, 512)     conv1 block-Toeplitz weights
    # b1_ref  : (1, 512)
    # w2_ref  : (5, 128, 128)     conv2 block-Toeplitz weights
    # b2_ref  : (1, 128)
    # o_ref   : (1, 1, tp2, 32)
    nh = tp2 + 4                              # conv1/pool1 blocks incl. +-2 halo
    j0 = pl.program_id(1) * tp2               # first final frame of this tile

    # Haloed raw tile: blocks j0-3 .. j0+tp2+2, lane-dense (tp2+6, 128).
    rfull = jnp.concatenate(
        [halo_ref[0, 0, 0:3], xc_ref[0, 0], halo_ref[0, 0, 3:6]], axis=0)

    # ---- stage 1: Conv1d(1->16, k=65, s=4) + bias + ReLU --------------------
    # Conv block n (global g = j0-2+n) reads raw blocks g-1, g, g+1 =
    # rfull rows n, n+1, n+2.  Its 32 frames x 16 channels land on 512 lanes
    # ordered as 128*q + 16*m' + o (frame i = 4*m' + q) so that AvgPool1d(4)
    # later reduces to aligned 128-lane-group adds.
    acc1 = (jnp.dot(rfull[0:nh], w1_ref[0], preferred_element_type=jnp.float32)
            + jnp.dot(rfull[1:nh + 1], w1_ref[1],
                      preferred_element_type=jnp.float32))
    acc1 = acc1 + jnp.dot(rfull[2:nh + 2], w1_ref[2],
                          preferred_element_type=jnp.float32)
    y1 = jnp.maximum(acc1 + b1_ref[...], 0.0)                    # (nh, 512)

    # Frames in conv2's zero-padding region must be exactly zero (not
    # relu(b1)).  The padding boundary is block-aligned, so mask whole blocks
    # by global block index.
    gblk = jax.lax.broadcasted_iota(jnp.int32, (nh, 1), 0) + (j0 - 2)
    y1 = y1 * ((gblk >= 0) & (gblk < n_frames)).astype(jnp.float32)

    # ---- AvgPool1d(4): sum of the 4 aligned 128-lane groups -----------------
    p1 = (y1[:, 0:128] + y1[:, 128:256]
          + y1[:, 256:384] + y1[:, 384:512]) * 0.25              # (nh, 128)

    # ---- stage 2: Conv1d(16->32, k=33, s=2) + bias + ReLU --------------------
    # Final frame fl needs pool1 blocks fl .. fl+4 (local rows); channels x
    # taps are folded into K = 5*128 via 5 shifted (tp2,128)@(128,128) matmuls.
    acc2 = (jnp.dot(p1[0:tp2], w2_ref[0], preferred_element_type=jnp.float32)
            + jnp.dot(p1[1:tp2 + 1], w2_ref[1],
                      preferred_element_type=jnp.float32))
    acc2 = acc2 + (jnp.dot(p1[2:tp2 + 2], w2_ref[2],
                           preferred_element_type=jnp.float32)
                   + jnp.dot(p1[3:tp2 + 3], w2_ref[3],
                             preferred_element_type=jnp.float32))
    acc2 = acc2 + jnp.dot(p1[4:tp2 + 4], w2_ref[4],
                          preferred_element_type=jnp.float32)
    y2 = jnp.maximum(acc2 + b2_ref[...], 0.0)                    # (tp2, 128)

    # ---- AvgPool1d(4): output lanes are ordered 32*u + p ---------------------
    out = (y2[:, 0:32] + y2[:, 32:64] + y2[:, 64:96] + y2[:, 96:128]) * 0.25
    o_ref[0, 0] = out.astype(o_ref.dtype)                        # (tp2, 32)


# ----------------------------------------------------------------------------
# Weight re-layout (block-Toeplitz), done once in XLA on tiny tensors.
# ----------------------------------------------------------------------------
def _prep_w1(w1, b1):
    """(16,1,65) -> stacked (3,128,512); bias -> (1,512).

    Column layout: col = 128*q + 16*m' + o, conv1 frame-in-block i = 4*m' + q.
    Row layout: s indexes raw sample 128*(g-1) + s for conv block g; the
    needed tap is k = s - 96 - 4*i (banded, zero elsewhere).
    """
    w1k = w1[:, 0, :]                                   # (16, 65)
    s = jnp.arange(384)[:, None]                        # (384, 1)
    col = jnp.arange(512)[None, :]                      # (1, 512)
    q = col // 128
    mp = (col % 128) // 16
    o = col % 16
    i = 4 * mp + q
    k = s - 96 - 4 * i                                  # (384, 512)
    valid = (k >= 0) & (k <= 64)
    w = jnp.where(valid, w1k[o, jnp.clip(k, 0, 64)], 0.0)
    return w.reshape(3, 128, 512), jnp.tile(b1, 32).reshape(1, 512)


def _prep_w2(w2, b2):
    """(32,16,33) -> stacked (5,128,128); bias -> (1,128).

    Row layout: row = 16*m' + c (pool1 frame-in-block m', channel c).
    Column layout: col = 32*u + p (conv2 frame-in-final-frame u, channel p).
    Tap: k = 8*d + m' - 2*u for shift d in [0,5) (banded, zero elsewhere).
    """
    d = jnp.arange(5)[:, None, None]
    row = jnp.arange(128)[None, :, None]
    col = jnp.arange(128)[None, None, :]
    mp = row // 16
    c = row % 16
    u = col // 32
    p = col % 32
    k = 8 * d + mp - 2 * u                              # (5, 128, 128)
    valid = (k >= 0) & (k <= 32)
    w = jnp.where(valid, w2[p, c, jnp.clip(k, 0, 32)], 0.0)
    return w, jnp.tile(b2, 4).reshape(1, 128)


# ----------------------------------------------------------------------------
# Wrapper: tiling, halo slab, pallas_call, final (tiny) transpose.
# ----------------------------------------------------------------------------
def feature_extractor(x_ncl, w1, b1, w2, b2, tile_frames=128):
    """x_ncl: (B, 1, L) float32, L % 128 == 0.  Returns (B, 32, L//128)."""
    b, cin, l = x_ncl.shape
    assert cin == 1
    assert l % 128 == 0, "input length must be a multiple of 128"
    n_frames = l // 128

    # Largest divisor of n_frames that fits tile_frames (per-generation tunable:
    # larger amortizes per-step overhead; keep b*n_tiles >= 2 for v7x's 2 TCs).
    tp2 = max(1, min(tile_frames, n_frames))
    while n_frames % tp2:
        tp2 -= 1
    n_tiles = n_frames // tp2

    # Center blocks: zero-copy reshape, auto-pipelined by BlockSpec.
    xt = x_ncl.reshape(b, n_tiles, tp2, 128)

    # Halo slab: 3 raw blocks on each side of every tile (~6/tp2 of the input
    # bytes), built from cheap slices -- no full pad+gather HBM pass.
    if n_tiles == 1:
        halo = jnp.zeros((b, 1, 6, 128), x_ncl.dtype)
    else:
        assert tp2 >= 3, "tile_frames must be >= 3 when using multiple tiles"
        zero3 = jnp.zeros((b, 1, 3, 128), x_ncl.dtype)
        left = jnp.concatenate([zero3, xt[:, :-1, tp2 - 3:, :]], axis=1)
        right = jnp.concatenate([xt[:, 1:, :3, :], zero3], axis=1)
        halo = jnp.concatenate([left, right], axis=2)       # (b, n_tiles, 6, 128)

    w1p, b1r = _prep_w1(w1, b1)
    w2p, b2r = _prep_w2(w2, b2)

    kernel = functools.partial(_fused_kernel, tp2=tp2, n_frames=n_frames)
    out = pl.pallas_call(
        kernel,
        out_shape=jax.ShapeDtypeStruct((b, n_tiles, tp2, 32), jnp.float32),
        grid=(b, n_tiles),
        in_specs=[
            pl.BlockSpec((1, 1, tp2, 128), lambda i, j: (i, j, 0, 0)),
            pl.BlockSpec((1, 1, 6, 128), lambda i, j: (i, j, 0, 0)),
            pl.BlockSpec((3, 128, 512), lambda i, j: (0, 0, 0)),
            pl.BlockSpec((1, 512), lambda i, j: (0, 0)),
            pl.BlockSpec((5, 128, 128), lambda i, j: (0, 0, 0)),
            pl.BlockSpec((1, 128), lambda i, j: (0, 0)),
        ],
        out_specs=pl.BlockSpec((1, 1, tp2, 32), lambda i, j: (i, j, 0, 0)),
        compiler_params=pltpu.CompilerParams(
            dimension_semantics=("parallel", "parallel"),
            vmem_limit_bytes=48 * 1024 * 1024),
    )(xt, halo, w1p, b1r, w2p, b2r)

    # (B, n_tiles, tp2, 32) -> NCL (B, 32, L//128); only touches the small
    # final tensor (1/4 of the f32 input bytes).
    return jnp.transpose(out.reshape(b, n_frames, 32), (0, 2, 1))


# ----------------------------------------------------------------------------
# SpectroFeatureLoss glue (plain JAX around the fused feature kernel).
# ----------------------------------------------------------------------------
def spectro_feature_loss(outputs, targets, w1, b1, w2, b2, alpha=0.8,
                         spectrogram_to_waveform=None, tile_frames=128):
    assert outputs.shape == targets.shape, "Target and estimate must match"
    mse = jnp.mean(jnp.square(outputs - targets))
    # TODO(synk): spectrogram_to_waveform is defined outside the reference
    # module; default to treating the (B, 1, L) inputs directly as waveforms.
    to_wave = (spectrogram_to_waveform if spectrogram_to_waveform is not None
               else (lambda s: s))
    fo = feature_extractor(to_wave(outputs), w1, b1, w2, b2, tile_frames)
    ft = feature_extractor(to_wave(targets), w1, b1, w2, b2, tile_frames)
    l1 = jnp.mean(jnp.abs(fo - ft))
    return alpha * mse + (1.0 - alpha) * l1


# ----------------------------------------------------------------------------
# Pure-JAX reference (for correctness check)
# ----------------------------------------------------------------------------
def _ref_forward(x, w1, b1, w2, b2):
    dn = ("NCH", "OIH", "NCH")
    y = jax.lax.conv_general_dilated(x, w1, window_strides=(4,),
                                     padding=((32, 32),), dimension_numbers=dn)
    y = jnp.maximum(y + b1[None, :, None], 0.0)
    y = y.reshape(y.shape[0], y.shape[1], y.shape[2] // 4, 4).mean(-1)
    y = jax.lax.conv_general_dilated(y, w2, window_strides=(2,),
                                     padding=((16, 16),), dimension_numbers=dn)
    y = jnp.maximum(y + b2[None, :, None], 0.0)
    y = y.reshape(y.shape[0], y.shape[1], y.shape[2] // 4, 4).mean(-1)
    return y


if __name__ == "__main__":
    key = jax.random.PRNGKey(0)
    k_x, k_y, k_w1, k_b1, k_w2, k_b2 = jax.random.split(key, 6)

    B, L = 2, 2048                                     # (B, 1, 2048) -> (B, 32, 16)
    x = jax.random.normal(k_x, (B, 1, L), jnp.float32)

    # Deterministic synthetic parameters (shapes from the nn.Conv1d defs).
    w1 = jax.random.normal(k_w1, (16, 1, 65), jnp.float32) * 0.1
    b1 = jax.random.normal(k_b1, (16,), jnp.float32) * 0.1
    w2 = jax.random.normal(k_w2, (32, 16, 33), jnp.float32) * 0.05
    b2 = jax.random.normal(k_b2, (32,), jnp.float32) * 0.1

    # tile_frames=8 -> 2 time-tiles per batch element, grid = (2, 2).
    run = jax.jit(functools.partial(feature_extractor, tile_frames=8))
    out = jax.block_until_ready(run(x, w1, b1, w2, b2))

    ref = jax.block_until_ready(_ref_forward(x, w1, b1, w2, b2))
    assert out.shape == (B, 32, L // 128), out.shape
    assert jnp.allclose(out, ref, rtol=1e-4, atol=1e-4), "mismatch vs reference"

    # Loss glue (MSE + L1-on-features + alpha mix), single-tile path grid (2, 1).
    y = jax.random.normal(k_y, (B, 1, L), jnp.float32)
    loss = jax.block_until_ready(jax.jit(spectro_feature_loss)(x, y, w1, b1, w2, b2))
    assert jnp.isfinite(loss)

    print("KERNEL_OK")
</pallas_src>

<mosaic_0001>
module attributes {stable_mosaic.version = 11 : i64} {
  func.func @_fused_kernel(%arg0: i32, %arg1: i32, %arg2: memref<1x1x8x128xf32, #tpu.memory_space<vmem>>, %arg3: memref<1x1x6x128xf32, #tpu.memory_space<vmem>>, %arg4: memref<3x128x512xf32, #tpu.memory_space<vmem>>, %arg5: memref<1x512xf32, #tpu.memory_space<vmem>>, %arg6: memref<5x128x128xf32, #tpu.memory_space<vmem>>, %arg7: memref<1x128xf32, #tpu.memory_space<vmem>>, %arg8: memref<1x1x8x32xf32, #tpu.memory_space<vmem>>) attributes {dimension_semantics = [#tpu.dimension_semantics<parallel>, #tpu.dimension_semantics<parallel>], iteration_bounds = array<i64: 2, 2>, scalar_prefetch = 0 : i64, scratch_operands = 0 : i64, tpu.core_type = #tpu.core_type<tc>, window_params = [{transform_indices = @transform_0, window_bounds = array<i64: 1, 1, 8, 128>}, {transform_indices = @transform_1, window_bounds = array<i64: 1, 1, 6, 128>}, {pipeline_mode = #tpu.pipeline_mode<synchronous>, transform_indices = @transform_2, window_bounds = array<i64: 3, 128, 512>}, {pipeline_mode = #tpu.pipeline_mode<synchronous>, transform_indices = @transform_3, window_bounds = array<i64: 1, 512>}, {pipeline_mode = #tpu.pipeline_mode<synchronous>, transform_indices = @transform_4, window_bounds = array<i64: 5, 128, 128>}, {pipeline_mode = #tpu.pipeline_mode<synchronous>, transform_indices = @transform_5, window_bounds = array<i64: 1, 128>}, {transform_indices = @transform_6, window_bounds = array<i64: 1, 1, 8, 32>}]} {
    %c8_i32 = arith.constant 8 : i32
    %0 = arith.muli %arg1, %c8_i32 : i32
    %c0 = arith.constant 0 : index
    %c0_0 = arith.constant 0 : index
    %c0_1 = arith.constant 0 : index
    %c0_2 = arith.constant 0 : index
    %1 = vector.load %arg3[%c0, %c0_0, %c0_1, %c0_2] : memref<1x1x6x128xf32, #tpu.memory_space<vmem>>, vector<1x1x3x128xf32>
    %2 = vector.shape_cast %1 : vector<1x1x3x128xf32> to vector<3x128xf32>
    %c0_3 = arith.constant 0 : index
    %c0_4 = arith.constant 0 : index
    %c0_5 = arith.constant 0 : index
    %c0_6 = arith.constant 0 : index
    %3 = vector.load %arg2[%c0_3, %c0_4, %c0_5, %c0_6] : memref<1x1x8x128xf32, #tpu.memory_space<vmem>>, vector<1x1x8x128xf32>
    %4 = vector.shape_cast %3 : vector<1x1x8x128xf32> to vector<8x128xf32>
    %c0_7 = arith.constant 0 : index
    %c0_8 = arith.constant 0 : index
    %c3 = arith.constant 3 : index
    %c0_9 = arith.constant 0 : index
    %5 = vector.load %arg3[%c0_7, %c0_8, %c3, %c0_9] : memref<1x1x6x128xf32, #tpu.memory_space<vmem>>, vector<1x1x3x128xf32>
    %6 = vector.shape_cast %5 : vector<1x1x3x128xf32> to vector<3x128xf32>
    %7 = tpu.concatenate %2, %4, %6 in 0 : vector<3x128xf32>, vector<8x128xf32>, vector<3x128xf32> -> vector<14x128xf32>
    %8 = vector.extract_strided_slice %7 {offsets = [0, 0], sizes = [12, 128], strides = [1, 1]} : vector<14x128xf32> to vector<12x128xf32>
    %c0_10 = arith.constant 0 : index
    %c0_11 = arith.constant 0 : index
    %c0_12 = arith.constant 0 : index
    %9 = vector.load %arg4[%c0_10, %c0_11, %c0_12] : memref<3x128x512xf32, #tpu.memory_space<vmem>>, vector<1x128x512xf32>
    %10 = vector.shape_cast %9 : vector<1x128x512xf32> to vector<128x512xf32>
    %cst = arith.constant dense<0.000000e+00> : vector<12x512xf32>
    %11 = tpu.matmul %8, %10, %cst {dimension_numbers = #tpu.dot_dimension_numbers<[1], [0], [0], [1], [0, 0, 1, 1], [], []>} : vector<12x128xf32>, vector<128x512xf32>, vector<12x512xf32> -> vector<12x512xf32>
    %12 = vector.extract_strided_slice %7 {offsets = [1, 0], sizes = [12, 128], strides = [1, 1]} : vector<14x128xf32> to vector<12x128xf32>
    %c1 = arith.constant 1 : index
    %c0_13 = arith.constant 0 : index
    %c0_14 = arith.constant 0 : index
    %13 = vector.load %arg4[%c1, %c0_13, %c0_14] : memref<3x128x512xf32, #tpu.memory_space<vmem>>, vector<1x128x512xf32>
    %14 = vector.shape_cast %13 : vector<1x128x512xf32> to vector<128x512xf32>
    %cst_15 = arith.constant dense<0.000000e+00> : vector<12x512xf32>
    %15 = tpu.matmul %12, %14, %cst_15 {dimension_numbers = #tpu.dot_dimension_numbers<[1], [0], [0], [1], [0, 0, 1, 1], [], []>} : vector<12x128xf32>, vector<128x512xf32>, vector<12x512xf32> -> vector<12x512xf32>
    %16 = arith.addf %11, %15 : vector<12x512xf32>
    %17 = vector.extract_strided_slice %7 {offsets = [2, 0], sizes = [12, 128], strides = [1, 1]} : vector<14x128xf32> to vector<12x128xf32>
    %c2 = arith.constant 2 : index
    %c0_16 = arith.constant 0 : index
    %c0_17 = arith.constant 0 : index
    %18 = vector.load %arg4[%c2, %c0_16, %c0_17] : memref<3x128x512xf32, #tpu.memory_space<vmem>>, vector<1x128x512xf32>
    %19 = vector.shape_cast %18 : vector<1x128x512xf32> to vector<128x512xf32>
    %cst_18 = arith.constant dense<0.000000e+00> : vector<12x512xf32>
    %20 = tpu.matmul %17, %19, %cst_18 {dimension_numbers = #tpu.dot_dimension_numbers<[1], [0], [0], [1], [0, 0, 1, 1], [], []>} : vector<12x128xf32>, vector<128x512xf32>, vector<12x512xf32> -> vector<12x512xf32>
    %21 = arith.addf %16, %20 : vector<12x512xf32>
    %c0_19 = arith.constant 0 : index
    %c0_20 = arith.constant 0 : index
    %22 = vector.load %arg5[%c0_19, %c0_20] : memref<1x512xf32, #tpu.memory_space<vmem>>, vector<1x512xf32>
    %23 = vector.broadcast %22 : vector<1x512xf32> to vector<12x512xf32>
    %24 = arith.addf %21, %23 : vector<12x512xf32>
    %cst_21 = arith.constant 0.000000e+00 : f32
    %25 = vector.broadcast %cst_21 : f32 to vector<12x512xf32>
    %26 = arith.maximumf %24, %25 : vector<12x512xf32>
    %27 = tpu.iota {dimensions = array<i32: 0>} : vector<12x1xi32>
    %c2_i32 = arith.constant 2 : i32
    %28 = arith.subi %0, %c2_i32 : i32
    %29 = vector.broadcast %28 : i32 to vector<12x1xi32>
    %30 = arith.addi %27, %29 : vector<12x1xi32>
    %c0_i32 = arith.constant 0 : i32
    %31 = vector.broadcast %c0_i32 : i32 to vector<12x1xi32>
    %32 = arith.cmpi sge, %30, %31 : vector<12x1xi32>
    %c16_i32 = arith.constant 16 : i32
    %33 = vector.broadcast %c16_i32 : i32 to vector<12x1xi32>
    %34 = arith.cmpi slt, %30, %33 : vector<12x1xi32>
    %35 = arith.andi %32, %34 : vector<12x1xi1>
    %36 = arith.extui %35 : vector<12x1xi1> to vector<12x1xi32>
    %37 = arith.sitofp %36 : vector<12x1xi32> to vector<12x1xf32>
    %38 = vector.broadcast %37 : vector<12x1xf32> to vector<12x512xf32>
    %39 = arith.mulf %26, %38 : vector<12x512xf32>
    %40 = vector.extract_strided_slice %39 {offsets = [0, 0], sizes = [12, 128], strides = [1, 1]} : vector<12x512xf32> to vector<12x128xf32>
    %41 = vector.extract_strided_slice %39 {offsets = [0, 128], sizes = [12, 128], strides = [1, 1]} : vector<12x512xf32> to vector<12x128xf32>
    %42 = arith.addf %40, %41 : vector<12x128xf32>
    %43 = vector.extract_strided_slice %39 {offsets = [0, 256], sizes = [12, 128], strides = [1, 1]} : vector<12x512xf32> to vector<12x128xf32>
    %44 = arith.addf %42, %43 : vector<12x128xf32>
    %45 = vector.extract_strided_slice %39 {offsets = [0, 384], sizes = [12, 128], strides = [1, 1]} : vector<12x512xf32> to vector<12x128xf32>
    %46 = arith.addf %44, %45 : vector<12x128xf32>
    %cst_22 = arith.constant 2.500000e-01 : f32
    %47 = vector.broadcast %cst_22 : f32 to vector<12x128xf32>
    %48 = arith.mulf %46, %47 : vector<12x128xf32>
    %49 = vector.extract_strided_slice %48 {offsets = [0, 0], sizes = [8, 128], strides = [1, 1]} : vector<12x128xf32> to vector<8x128xf32>
    %c0_23 = arith.constant 0 : index
    %c0_24 = arith.constant 0 : index
    %c0_25 = arith.constant 0 : index
    %50 = vector.load %arg6[%c0_23, %c0_24, %c0_25] : memref<5x128x128xf32, #tpu.memory_space<vmem>>, vector<1x128x128xf32>
    %51 = vector.shape_cast %50 : vector<1x128x128xf32> to vector<128x128xf32>
    %cst_26 = arith.constant dense<0.000000e+00> : vector<8x128xf32>
    %52 = tpu.matmul %49, %51, %cst_26 {dimension_numbers = #tpu.dot_dimension_numbers<[1], [0], [0], [1], [0, 0, 1, 1], [], []>} : vector<8x128xf32>, vector<128x128xf32>, vector<8x128xf32> -> vector<8x128xf32>
    %53 = vector.extract_strided_slice %48 {offsets = [1, 0], sizes = [8, 128], strides = [1, 1]} : vector<12x128xf32> to vector<8x128xf32>
    %c1_27 = arith.constant 1 : index
    %c0_28 = arith.constant 0 : index
    %c0_29 = arith.constant 0 : index
    %54 = vector.load %arg6[%c1_27, %c0_28, %c0_29] : memref<5x128x128xf32, #tpu.memory_space<vmem>>, vector<1x128x128xf32>
    %55 = vector.shape_cast %54 : vector<1x128x128xf32> to vector<128x128xf32>
    %cst_30 = arith.constant dense<0.000000e+00> : vector<8x128xf32>
    %56 = tpu.matmul %53, %55, %cst_30 {dimension_numbers = #tpu.dot_dimension_numbers<[1], [0], [0], [1], [0, 0, 1, 1], [], []>} : vector<8x128xf32>, vector<128x128xf32>, vector<8x128xf32> -> vector<8x128xf32>
    %57 = arith.addf %52, %56 : vector<8x128xf32>
    %58 = vector.extract_strided_slice %48 {offsets = [2, 0], sizes = [8, 128], strides = [1, 1]} : vector<12x128xf32> to vector<8x128xf32>
    %c2_31 = arith.constant 2 : index
    %c0_32 = arith.constant 0 : index
    %c0_33 = arith.constant 0 : index
    %59 = vector.load %arg6[%c2_31, %c0_32, %c0_33] : memref<5x128x128xf32, #tpu.memory_space<vmem>>, vector<1x128x128xf32>
    %60 = vector.shape_cast %59 : vector<1x128x128xf32> to vector<128x128xf32>
    %cst_34 = arith.constant dense<0.000000e+00> : vector<8x128xf32>
    %61 = tpu.matmul %58, %60, %cst_34 {dimension_numbers = #tpu.dot_dimension_numbers<[1], [0], [0], [1], [0, 0, 1, 1], [], []>} : vector<8x128xf32>, vector<128x128xf32>, vector<8x128xf32> -> vector<8x128xf32>
    %62 = vector.extract_strided_slice %48 {offsets = [3, 0], sizes = [8, 128], strides = [1, 1]} : vector<12x128xf32> to vector<8x128xf32>
    %c3_35 = arith.constant 3 : index
    %c0_36 = arith.constant 0 : index
    %c0_37 = arith.constant 0 : index
    %63 = vector.load %arg6[%c3_35, %c0_36, %c0_37] : memref<5x128x128xf32, #tpu.memory_space<vmem>>, vector<1x128x128xf32>
    %64 = vector.shape_cast %63 : vector<1x128x128xf32> to vector<128x128xf32>
    %cst_38 = arith.constant dense<0.000000e+00> : vector<8x128xf32>
    %65 = tpu.matmul %62, %64, %cst_38 {dimension_numbers = #tpu.dot_dimension_numbers<[1], [0], [0], [1], [0, 0, 1, 1], [], []>} : vector<8x128xf32>, vector<128x128xf32>, vector<8x128xf32> -> vector<8x128xf32>
    %66 = arith.addf %61, %65 : vector<8x128xf32>
    %67 = arith.addf %57, %66 : vector<8x128xf32>
    %68 = vector.extract_strided_slice %48 {offsets = [4, 0], sizes = [8, 128], strides = [1, 1]} : vector<12x128xf32> to vector<8x128xf32>
    %c4 = arith.constant 4 : index
    %c0_39 = arith.constant 0 : index
    %c0_40 = arith.constant 0 : index
    %69 = vector.load %arg6[%c4, %c0_39, %c0_40] : memref<5x128x128xf32, #tpu.memory_space<vmem>>, vector<1x128x128xf32>
    %70 = vector.shape_cast %69 : vector<1x128x128xf32> to vector<128x128xf32>
    %cst_41 = arith.constant dense<0.000000e+00> : vector<8x128xf32>
    %71 = tpu.matmul %68, %70, %cst_41 {dimension_numbers = #tpu.dot_dimension_numbers<[1], [0], [0], [1], [0, 0, 1, 1], [], []>} : vector<8x128xf32>, vector<128x128xf32>, vector<8x128xf32> -> vector<8x128xf32>
    %72 = arith.addf %67, %71 : vector<8x128xf32>
    %c0_42 = arith.constant 0 : index
    %c0_43 = arith.constant 0 : index
    %73 = vector.load %arg7[%c0_42, %c0_43] : memref<1x128xf32, #tpu.memory_space<vmem>>, vector<1x128xf32>
    %74 = vector.broadcast %73 : vector<1x128xf32> to vector<8x128xf32>
    %75 = arith.addf %72, %74 : vector<8x128xf32>
    %cst_44 = arith.constant 0.000000e+00 : f32
    %76 = vector.broadcast %cst_44 : f32 to vector<8x128xf32>
    %77 = arith.maximumf %75, %76 : vector<8x128xf32>
    %78 = vector.extract_strided_slice %77 {offsets = [0, 0], sizes = [8, 32], strides = [1, 1]} : vector<8x128xf32> to vector<8x32xf32>
    %79 = vector.extract_strided_slice %77 {offsets = [0, 32], sizes = [8, 32], strides = [1, 1]} : vector<8x128xf32> to vector<8x32xf32>
    %80 = arith.addf %78, %79 : vector<8x32xf32>
    %81 = vector.extract_strided_slice %77 {offsets = [0, 64], sizes = [8, 32], strides = [1, 1]} : vector<8x128xf32> to vector<8x32xf32>
    %82 = arith.addf %80, %81 : vector<8x32xf32>
    %83 = vector.extract_strided_slice %77 {offsets = [0, 96], sizes = [8, 32], strides = [1, 1]} : vector<8x128xf32> to vector<8x32xf32>
    %84 = arith.addf %82, %83 : vector<8x32xf32>
    %cst_45 = arith.constant 2.500000e-01 : f32
    %85 = vector.broadcast %cst_45 : f32 to vector<8x32xf32>
    %86 = arith.mulf %84, %85 : vector<8x32xf32>
    %c0_46 = arith.constant 0 : index
    %c0_47 = arith.constant 0 : index
    %c0_48 = arith.constant 0 : index
    %c0_49 = arith.constant 0 : index
    %87 = vector.load %arg8[%c0_46, %c0_47, %c0_48, %c0_49] : memref<1x1x8x32xf32, #tpu.memory_space<vmem>>, vector<1x1x8x32xf32>
    %88 = vector.shape_cast %87 : vector<1x1x8x32xf32> to vector<8x32xf32>
    %89 = vector.shape_cast %86 : vector<8x32xf32> to vector<1x1x8x32xf32>
    tpu.vector_store %arg8[%c0_46, %c0_47, %c0_48, %c0_49], %89 {strides = array<i32>} : memref<1x1x8x32xf32, #tpu.memory_space<vmem>>, vector<1x1x8x32xf32>,
    return
  }
  func.func @transform_0(%arg0: i32, %arg1: i32) -> (i32, i32, i32, i32) {
    %c0_i32 = arith.constant 0 : i32
    %c0_i32_0 = arith.constant 0 : i32
    %c0_i32_1 = arith.constant 0 : i32
    return %arg0, %arg1, %c0_i32, %c0_i32_0 : i32, i32, i32, i32
  }
  func.func @transform_1(%arg0: i32, %arg1: i32) -> (i32, i32, i32, i32) {
    %c0_i32 = arith.constant 0 : i32
    %c0_i32_0 = arith.constant 0 : i32
    %c0_i32_1 = arith.constant 0 : i32
    return %arg0, %arg1, %c0_i32, %c0_i32_0 : i32, i32, i32, i32
  }
  func.func @transform_2(%arg0: i32, %arg1: i32) -> (i32, i32, i32) {
    %c0_i32 = arith.constant 0 : i32
    %c0_i32_0 = arith.constant 0 : i32
    %c0_i32_1 = arith.constant 0 : i32
    %c0_i32_2 = arith.constant 0 : i32
    return %c0_i32, %c0_i32_0, %c0_i32_1 : i32, i32, i32
  }
  func.func @transform_3(%arg0: i32, %arg1: i32) -> (i32, i32) {
    %c0_i32 = arith.constant 0 : i32
    %c0_i32_0 = arith.constant 0 : i32
    %c0_i32_1 = arith.constant 0 : i32
    return %c0_i32, %c0_i32_0 : i32, i32
  }
  func.func @transform_4(%arg0: i32, %arg1: i32) -> (i32, i32, i32) {
    %c0_i32 = arith.constant 0 : i32
    %c0_i32_0 = arith.constant 0 : i32
    %c0_i32_1 = arith.constant 0 : i32
    %c0_i32_2 = arith.constant 0 : i32
    return %c0_i32, %c0_i32_0, %c0_i32_1 : i32, i32, i32
  }
  func.func @transform_5(%arg0: i32, %arg1: i32) -> (i32, i32) {
    %c0_i32 = arith.constant 0 : i32
    %c0_i32_0 = arith.constant 0 : i32
    %c0_i32_1 = arith.constant 0 : i32
    return %c0_i32, %c0_i32_0 : i32, i32
  }
  func.func @transform_6(%arg0: i32, %arg1: i32) -> (i32, i32, i32, i32) {
    %c0_i32 = arith.constant 0 : i32
    %c0_i32_0 = arith.constant 0 : i32
    %c0_i32_1 = arith.constant 0 : i32
    return %arg0, %arg1, %c0_i32, %c0_i32_0 : i32, i32, i32, i32
  }
}

</mosaic_0001>

<bundles_post_ra>
// kernel: tile.13
= control target key start
LH: loop header
LB: loop body
LE: loop exit
PB: predicated region body
PF: predicated region fallthrough
CT: control target
= control target key end

     0   :  { %s40_s0 = inlined_call_operand.vmem [shape: f32[16], index: 0, kind: input, shape index: {}]   ;;  %s41_s1 = inlined_call_operand.vmem [shape: f32[32,16], index: 1, kind: output, shape index: {}]  }
   0x1   :  { %v4_v0 = vld [vmem:[%s40_s0] ss:$0 sm:$0xff] }
   0x2   :  { %5 = vst [vmem:[%s41_s1] sm:$0xff] %v4_v0 }
   0x3   :  { %12 = vst [vmem:[%s41_s1 + $0x8] sm:$0xff] %v4_v0 }
   0x4   :  { %13 = vst [vmem:[%s41_s1 + $0x10] sm:$0xff] %v4_v0 }
   0x5   :  { %14 = vst [vmem:[%s41_s1 + $0x18] sm:$0xff] %v4_v0 }

// kernel: tile.14
= control target key start
LH: loop header
LB: loop body
LE: loop exit
PB: predicated region body
PF: predicated region fallthrough
CT: control target
= control target key end

     0   :  { %s88_s8 = smov 112   ;;  %s89_s11 = smov 80   ;;  %vm3_vm0 = vcmask 130048   ;;  %vm9_vm1 = vcmask 1048448   ;;  %vm15_vm2 = vcmask 917248   ;;  %vm21_vm3 = vcmask 786048   ;;  %s141_s0 = inlined_call_operand.vmem [shape: f32[32,16], index: 0, kind: input, shape index: {}]   ;;  %s142_s1 = inlined_call_operand.vmem [shape: f32[1,512], index: 1, kind: output, shape index: {}]  }
   0x1   :  { %v71_v0 = vld [vmem:[%s141_s0 + $0x7] ss:$8 sm:$0xf]   ;;  %v73_v1 = vld [vmem:[%s141_s0 + $0x5] ss:$8 sm:$0xf]  }
   0x2   :  { %7 = vrot.lane.b32.xlu0 %v71_v0, %s88_s8  ;;  %19 = vrot.lane.b32.xlu1 %v73_v1, %s89_s11  ;;  %v75_v2 = vld [vmem:[%s141_s0 + $0x3] ss:$8 sm:$0xf]   ;;  %s90_s14 = smov 48   ;;  %s91_s19 = smov 96   ;;  %vm27_vm4 = vcmask 654848  }
   0x3   :  { %31 = vrot.lane.b32.xlu2 %v75_v2, %s90_s14  ;;  %v72_v3 = vld [vmem:[%s141_s0 + $0x6] ss:$8 sm:$0xf]   ;;  %v74_v4 = vld [vmem:[%s141_s0 + $0x4] ss:$8 sm:$0xf]  }
   0x4   :  { %s92_s20 = smov 64   ;;  %v76_v5 = vld [vmem:[%s141_s0 + $0x2] ss:$8 sm:$0xf]   ;;  %s93_s23 = smov 32   ;;  %vm33_vm5 = vcmask 523648  }
   0x5   :  { %v77_v6 = vld [vmem:[%s141_s0 + $0x1] ss:$8 sm:$0xf]   ;;  %s94_s26 = smov 16   ;;  %vm39_vm6 = vcmask 392448   ;;  %vm45_vm7 = vcmask 261248  }
   0x6   :  { %v2_v7 = vld [vmem:[%s141_s0] ss:$8 sm:$0xf]  }
   0x7   :  { %4 = vst.msk [vmem:[#allocation0] ss:$8 sm:$0xf] %vm3_vm0, %v2_v7  }
   0xa   :  { %13 = vrot.lane.b32.xlu0 %v72_v3, %s91_s19  ;;  %25 = vrot.lane.b32.xlu1 %v74_v4, %s92_s20 }
   0xb   :  { %37 = vrot.lane.b32.xlu2 %v76_v5, %s93_s23 }
  0x12   :  { %43 = vrot.lane.b32.xlu0 %v77_v6, %s94_s26 }
  0x5d   :  { %v32_v8 = vpop.permute.xlu2 %31  }
  0x65   :  { %v38_v9 = vpop.permute.xlu2 %37  }
  0x74   :  { %v8_v10 = vpop.permute.xlu0 %7   ;;  %v20_v11 = vpop.permute.xlu1 %19  }
  0x75   :  { %10 = vst.msk [vmem:[#allocation0] ss:$8 sm:$0xf] %vm9_vm1, %v8_v10  }
  0x7c   :  { %v14_v12 = vpop.permute.xlu0 %13   ;;  %v26_v13 = vpop.permute.xlu1 %25  }
  0x7d   :  { %16 = vst.msk [vmem:[#allocation0] ss:$8 sm:$0xf] %vm15_vm2, %v14_v12  }
  0x7e   :  { %22 = vst.msk [vmem:[#allocation0] ss:$8 sm:$0xf] %vm21_vm3, %v20_v11  }
  0x7f   :  { %28 = vst.msk [vmem:[#allocation0] ss:$8 sm:$0xf] %vm27_vm4, %v26_v13  }
  0x80   :  { %34 = vst.msk [vmem:[#allocation0] ss:$8 sm:$0xf] %vm33_vm5, %v32_v8  }
  0x81   :  { %40 = vst.msk [vmem:[#allocation0] ss:$8 sm:$0xf] %vm39_vm6, %v38_v9  }
  0x84   :  { %v44_v14 = vpop.permute.xlu0 %43  }
  0x85   :  { %46 = vst.msk [vmem:[#allocation0] ss:$8 sm:$0xf] %vm45_vm7, %v44_v14  }
  0x8c   :  { %v49_v15 = vld [vmem:[#allocation0] sm:$0x1]  ;;  %v54_v16 = vld [vmem:[#allocation0 + $0x8] sm:$0x1]  ;;  %v60_v17 = vld [vmem:[#allocation0 + $0x10] sm:$0x1] }
  0x8d   :  { %52 = vst [vmem:[%s142_s1] sm:$0x1] %v49_v15  ;;  %v66_v18 = vld [vmem:[#allocation0 + $0x18] sm:$0x1] }
  0x8e   :  { %78 = vst [vmem:[%s142_s1 + $0x1] sm:$0x1] %v54_v16 }
  0x8f   :  { %79 = vst [vmem:[%s142_s1 + $0x2] sm:$0x1] %v60_v17 }
  0x90   :  { %80 = vst [vmem:[%s142_s1 + $0x3] sm:$0x1] %v66_v18 }

// kernel: tile.18
= control target key start
LH: loop header
LB: loop body
LE: loop exit
PB: predicated region body
PF: predicated region fallthrough
CT: control target
= control target key end

     0   :  { %s22_s0 = inlined_call_operand.vmem [shape: f32[32], index: 0, kind: input, shape index: {}]   ;;  %s23_s1 = inlined_call_operand.vmem [shape: f32[4,32], index: 1, kind: output, shape index: {}]  }
   0x1   :  { %v4_v0 = vld [vmem:[%s22_s0] ss:$0 sm:$0xff] }
   0x2   :  { %5 = vst [vmem:[%s23_s1] sm:$0xf] %v4_v0 }

// kernel: tile.19
= control target key start
LH: loop header
LB: loop body
LE: loop exit
PB: predicated region body
PF: predicated region fallthrough
CT: control target
= control target key end

     0   :  { %s37_s8 = smov 32   ;;  %s38_s9 = smov 64   ;;  %vm7_vm0 = vcmask 261120   ;;  %vm13_vm1 = vcmask 1048320   ;;  %vm19_vm2 = vcmask 785920   ;;  %vm25_vm3 = vcmask 523520   ;;  %s55_s0 = inlined_call_operand.vmem [shape: f32[4,32], index: 0, kind: input, shape index: {}]   ;;  %s56_s1 = inlined_call_operand.vmem [shape: f32[1,128], index: 1, kind: output, shape index: {}]  }
   0x1   :  { %v4_v0 = vld [vmem:[%s55_s0] sm:$0xf]  ;;  %s36_s0 = smov 96  }
   0x2   :  { %5 = vst [vmem:[#allocation1] sm:$0xf] %v4_v0 }
   0x9   :  { %v10_v1 = vld [vmem:[#allocation1 + $0x3] sm:$0x1]   ;;  %v22_v2 = vld [vmem:[#allocation1 + $0x1] sm:$0x1]   ;;  %v16_v3 = vld [vmem:[#allocation1 + $0x2] sm:$0x1]  }
   0xa   :  { %11 = vrot.lane.b32.xlu0 %v10_v1, %s36_s0  ;;  %23 = vrot.lane.b32.xlu1 %v22_v2, %s37_s8  ;;  %v6_v4 = vld [vmem:[#allocation1] sm:$0x1]  }
   0xb   :  { %8 = vst.msk [vmem:[#allocation0] sm:$0x1] %vm7_vm0, %v6_v4  }
  0x12   :  { %17 = vrot.lane.b32.xlu0 %v16_v3, %s38_s9 }
  0x7c   :  { %v12_v5 = vpop.permute.xlu0 %11   ;;  %v24_v6 = vpop.permute.xlu1 %23  }
  0x7d   :  { %14 = vst.msk [vmem:[#allocation0] sm:$0x1] %vm13_vm1, %v12_v5  }
  0x84   :  { %v18_v7 = vpop.permute.xlu0 %17  }
  0x85   :  { %20 = vst.msk [vmem:[#allocation0] sm:$0x1] %vm19_vm2, %v18_v7  }
  0x86   :  { %26 = vst.msk [vmem:[#allocation0] sm:$0x1] %vm25_vm3, %v24_v6  }
  0x8d   :  { %v29_v8 = vld [vmem:[#allocation0] sm:$0x1] }
  0x8e   :  { %32 = vst [vmem:[%s56_s1] sm:$0x1] %v29_v8 }

// kernel: feature_extractor.1
= control target key start
LH: loop header
LB: loop body
LE: loop exit
PB: predicated region body
PF: predicated region fallthrough
CT: control target
= control target key end

     0   :  { %11 = vsyncpa [#allocation3], 0  ;;  %s2671_s0 = inlined_call_operand.vmem [shape: f32[2,2,8,128], index: 0, kind: input, shape index: {}]   ;;  %s2672_s1 = inlined_call_operand.vmem [shape: f32[2,2,6,128], index: 1, kind: input, shape index: {}]   ;;  %s2673_s2 = inlined_call_operand.vmem [shape: f32[3,128,512], index: 2, kind: input, shape index: {}]   ;;  %s2674_s3 = inlined_call_operand.vmem [shape: f32[1,512], index: 3, kind: input, shape index: {}]   ;;  %s2675_s4 = inlined_call_operand.vmem [shape: f32[5,128,128], index: 4, kind: input, shape index: {}]   ;;  %s2676_s5 = inlined_call_operand.vmem [shape: f32[1,128], index: 5, kind: input, shape index: {}]   ;;  %s2677_s6 = inlined_call_operand.hbm [shape: f32[2,2,8,32], index: 6, kind: output, shape index: {}]  }
   0x1   :  { %13 = vsyncpa [#allocation3 + $0x1], 0  ;;  %s1634_s21 = smov 0   ;;  %s1636_s22 = smov 0  }
   0x2   :  { %s1638_s23 = smov 0   ;;  %s1640_s24 = smov 0  }
   0x3   :  { %s1642_s25 = smov 0   ;;  %s1644_s26 = smov 0  }
   0x4   :  { %s1646_s27 = smov 0   ;;  %s1648_s28 = smov 0  }
   0x5 LB: > { %s1212_s29 = sadd.s32 4294967295, %s1593_s28   ;;  %s1213_s30 = sadd.s32 4294967294, %s1593_s28   ;;  %s1593_s28 = sphi %s1648_s28, %s19_s28   ;;  %s1589_s27 = sphi %s1646_s27, %s2692_s27   ;;  %s1585_s26 = sphi %s1644_s26, %s2691_s26   ;;  %s1581_s25 = sphi %s1642_s25, %s2690_s25   ;;  %s1577_s24 = sphi %s1640_s24, %s2689_s24   ;;  %s1573_s23 = sphi %s1638_s23, %s2688_s23   ;;  %s1569_s22 = sphi %s1636_s22, %s2687_s22   ;;  %s1565_s21 = sphi %s1634_s21, %s2686_s21  }
   0x6   : > { %s28_s7 = sadd.s32 1, %s1585_s26  ;;  %s31_s8 = sadd.s32 1, %s1589_s27 }
   0x7   : > { %p29_p0 = scmp.ge.s32.totalorder %s28_s7, 2  ;;  %p190_p1 = scmp.ne.s32.totalorder %s1573_s23, %s1569_s22 }
   0x8   : > { %p191_p2 = scmp.eq.s32.totalorder %s1212_s29, 3  ;;  %p196_p5 = scmp.ne.s32.totalorder %s1569_s22, %s1565_s21 }
   0x9   : > { %s2694_s7 = smov (%p29_p0, %s28_s7), 0  ;;  %s2696_s8 = smov (!%p29_p0, %s31_s8), %s1589_s27 }
   0xa   : > { %2680 = sst [smem:[#allocation5_spill]] %s2694_s7  ;;  %s176_s9 = ssub.s32 %s1585_s26, %s2694_s7 }
   0xb   : > { %p1685_p3 = por %p191_p2, %p190_p1  ;;  %p33_p4 = scmp.ge.s32.totalorder %s2696_s8, 2 }
   0xc   : > { %p197_p6 = scmp.eq.s32.totalorder %s1213_s30, 3  ;;  %p1216_p7 = scmp.ge.s32.totalorder %s1593_s28, 1 }
   0xd   : > { %s2698_s8 = smov (%p33_p4, %s2696_s8), 0  ;;  %p249_p9 = scmp.lt.s32.totalorder %s1593_s28, 5 }
   0xe   : > { %2682 = sst [smem:[#allocation6_spill]] %s2698_s8  ;;  %p1694_p8 = por %p197_p6, %p196_p5 }
   0xf   : > { %s175_s12 = ssub.s32 %s1589_s27, %s2698_s8  ;;  %s180_s13 = sadd.s32 1, %s1573_s23 }
  0x10   : > { %s177_s14 = sor.u32 %s176_s9, %s175_s12  ;;  %p250_p10 = pnand %p1216_p7, %p249_p9 }
  0x11   : > { %p178_p11 = scmp.eq.s32.totalorder %s177_s14, 0  ;;  %p290_p12 = scmp.lt.s32.totalorder (!%p250_p10), %s1581_s25, 1 }
  0x12   : > { %253 = sbr.rel (%p250_p10) target bundleno = 561 (0x231), region = 44  ;;  %p292_p13 = scmp.lt.s32.totalorder (!%p250_p10), %s1577_s24, 1 }
  0x13   : > { %s1703_s15 = scalar_select %p178_p11, %s1573_s23, %s180_s13  }
  0x14   : > { %s1596_s29 = smov (!%p250_p10), 32   ;;  %s1597_s30 = smov (!%p250_p10), 96  }
  0x15   : > { %s1598_s12 = smov (!%p250_p10), 64  }
  0x17   : > { %v1283_v0 = vld [vmem:[%s2673_s2 + $0x3e0] sm:$0xff]  ;;  %v1284_v1 = vld [vmem:[%s2673_s2 + $0x3e8] sm:$0xff]  ;;  %v1285_v2 = vld [vmem:[%s2673_s2 + $0x3f0] sm:$0xff]  ;;  %s1824_s14 = scalar_select %p290_p12, %s1581_s25, 1  ;;  %vm316_vm0 = vcmask 1042432   ;;  %vm450_vm1 = vcmask 1046528  }
  0x18   : > { %456 = vmatpush.msra.mxu0 %v1283_v0  ;;  %479 = vmatpush.msra.mxu1 %v1284_v1  ;;  %v1286_v3 = vld [vmem:[%s2673_s2 + $0x3f8] sm:$0xff]  ;;  %v1279_v4 = vld [vmem:[%s2673_s2 + $0x3c0] sm:$0xff]  ;;  %v1280_v5 = vld [vmem:[%s2673_s2 + $0x3c8] sm:$0xff]  ;;  %s293_s18 = scalar_select %p292_p13, %s1577_s24, 1  ;;  %vm705_vm2 = vcmask 1045504   ;;  %vm983_vm9 = vcmask 1044480  }
  0x19   : > { %502 = vmatpush.msra.mxu2 %v1285_v2  ;;  %525 = vmatpush.msra.mxu3 %v1286_v3  ;;  %v1281_v6 = vld [vmem:[%s2673_s2 + $0x3d0] sm:$0xff]  ;;  %v1282_v7 = vld [vmem:[%s2673_s2 + $0x3d8] sm:$0xff]  ;;  %v1275_v8 = vld [vmem:[%s2673_s2 + $0x3a0] sm:$0xff]  ;;  %s1218_s9 = sshll.u32 %s1824_s14, 1  ;;  %vm1050_vm10 = vcmask 1043456   ;;  %vm1096_vm11 = vcmask 261120  }
  0x1a   : > { %457 = vmatpush.msra.mxu0 %v1279_v4  ;;  %480 = vmatpush.msra.mxu1 %v1280_v5  ;;  %v1276_v9 = vld [vmem:[%s2673_s2 + $0x3a8] sm:$0xff]  ;;  %v1277_v10 = vld [vmem:[%s2673_s2 + $0x3b0] sm:$0xff]  ;;  %v1278_v11 = vld [vmem:[%s2673_s2 + $0x3b8] sm:$0xff]  ;;  %s295_s16 = sadd.s32 %s1218_s9, %s293_s18  ;;  %s1222_s9 = sshll.u32 %s1577_s24, 3 }
  0x1b   : > { %503 = vmatpush.msra.mxu2 %v1281_v6  ;;  %526 = vmatpush.msra.mxu3 %v1282_v7  ;;  %v1271_v12 = vld [vmem:[%s2673_s2 + $0x380] sm:$0xff]  ;;  %v1272_v13 = vld [vmem:[%s2673_s2 + $0x388] sm:$0xff]  ;;  %v1273_v14 = vld [vmem:[%s2673_s2 + $0x390] sm:$0xff]  ;;  %s1219_s8 = sshll.u32 %s295_s16, 3  ;;  %s2526_s18 = sadd.s32 4294967294, %s1222_s9 }
  0x1c   : > { %458 = vmatpush.msra.mxu0 %v1275_v8  ;;  %481 = vmatpush.msra.mxu1 %v1276_v9  ;;  %v1274_v15 = vld [vmem:[%s2673_s2 + $0x398] sm:$0xff]  ;;  %v1267_v16 = vld [vmem:[%s2673_s2 + $0x360] sm:$0xff]  ;;  %v1268_v17 = vld [vmem:[%s2673_s2 + $0x368] sm:$0xff]  ;;  %s297_s14 = scalar_lea.vmem %s2671_s0, %s1219_s8  ;;  %s1914_s7 = scalar_lea.vmem %s2672_s1, %s1219_s8 }
  0x1d   : > { %504 = vmatpush.msra.mxu2 %v1277_v10  ;;  %527 = vmatpush.msra.mxu3 %v1278_v11  ;;  %v1269_v18 = vld [vmem:[%s2673_s2 + $0x370] sm:$0xff]  ;;  %v1270_v19 = vld [vmem:[%s2673_s2 + $0x378] sm:$0xff]  ;;  %v1263_v20 = vld [vmem:[%s2673_s2 + $0x340] sm:$0xff]  ;;  %s287_s16 = sand.u32 1, %s1569_s22  }
  0x1e   : > { %459 = vmatpush.msra.mxu0 %v1271_v12  ;;  %482 = vmatpush.msra.mxu1 %v1272_v13  ;;  %v1264_v21 = vld [vmem:[%s2673_s2 + $0x348] sm:$0xff]  ;;  %v1265_v22 = vld [vmem:[%s2673_s2 + $0x350] sm:$0xff]  ;;  %v1266_v23 = vld [vmem:[%s2673_s2 + $0x358] sm:$0xff]  ;;  %s1217_s17 = sshll.u32 %s287_s16, 3 }
  0x1f   : > { %505 = vmatpush.msra.mxu2 %v1273_v14  ;;  %528 = vmatpush.msra.mxu3 %v1274_v15  ;;  %v1259_v24 = vld [vmem:[%s2673_s2 + $0x320] sm:$0xff]  ;;  %v1260_v25 = vld [vmem:[%s2673_s2 + $0x328] sm:$0xff]  ;;  %v1261_v26 = vld [vmem:[%s2673_s2 + $0x330] sm:$0xff] }
  0x20   : > { %460 = vmatpush.msra.mxu0 %v1267_v16  ;;  %483 = vmatpush.msra.mxu1 %v1268_v17  ;;  %v1262_v27 = vld [vmem:[%s2673_s2 + $0x338] sm:$0xff]  ;;  %v1255_v28 = vld [vmem:[%s2673_s2 + $0x300] sm:$0xff]  ;;  %v1256_v29 = vld [vmem:[%s2673_s2 + $0x308] sm:$0xff] }
  0x21   : > { %506 = vmatpush.msra.mxu2 %v1269_v18  ;;  %529 = vmatpush.msra.mxu3 %v1270_v19  ;;  %v1257_v30 = vld [vmem:[%s2673_s2 + $0x310] sm:$0xff]  ;;  %v1258_v31 = vld [vmem:[%s2673_s2 + $0x318] sm:$0xff]  ;;  %v1251_v32 = vld [vmem:[%s2673_s2 + $0x2e0] sm:$0xff] }
  0x22   : > { %461 = vmatpush.msra.mxu0 %v1263_v20  ;;  %484 = vmatpush.msra.mxu1 %v1264_v21  ;;  %v1252_v33 = vld [vmem:[%s2673_s2 + $0x2e8] sm:$0xff]  ;;  %v1253_v34 = vld [vmem:[%s2673_s2 + $0x2f0] sm:$0xff]  ;;  %v1254_v35 = vld [vmem:[%s2673_s2 + $0x2f8] sm:$0xff] }
  0x23   : > { %507 = vmatpush.msra.mxu2 %v1265_v22  ;;  %530 = vmatpush.msra.mxu3 %v1266_v23  ;;  %v1247_v36 = vld [vmem:[%s2673_s2 + $0x2c0] sm:$0xff]  ;;  %v1248_v37 = vld [vmem:[%s2673_s2 + $0x2c8] sm:$0xff]  ;;  %v1249_v38 = vld [vmem:[%s2673_s2 + $0x2d0] sm:$0xff] }
  0x24   : > { %462 = vmatpush.msra.mxu0 %v1259_v24  ;;  %485 = vmatpush.msra.mxu1 %v1260_v25  ;;  %v1250_v39 = vld [vmem:[%s2673_s2 + $0x2d8] sm:$0xff]  ;;  %v1243_v40 = vld [vmem:[%s2673_s2 + $0x2a0] sm:$0xff]  ;;  %v1244_v41 = vld [vmem:[%s2673_s2 + $0x2a8] sm:$0xff] }
  0x25   : > { %508 = vmatpush.msra.mxu2 %v1261_v26  ;;  %531 = vmatpush.msra.mxu3 %v1262_v27  ;;  %v1245_v42 = vld [vmem:[%s2673_s2 + $0x2b0] sm:$0xff]  ;;  %v1246_v43 = vld [vmem:[%s2673_s2 + $0x2b8] sm:$0xff]  ;;  %v1239_v44 = vld [vmem:[%s2673_s2 + $0x280] sm:$0xff] }
  0x26   : > { %463 = vmatpush.msra.mxu0 %v1255_v28  ;;  %486 = vmatpush.msra.mxu1 %v1256_v29  ;;  %v1240_v45 = vld [vmem:[%s2673_s2 + $0x288] sm:$0xff]  ;;  %v1241_v46 = vld [vmem:[%s2673_s2 + $0x290] sm:$0xff]  ;;  %v1242_v47 = vld [vmem:[%s2673_s2 + $0x298] sm:$0xff] }
  0x27   : > { %509 = vmatpush.msra.mxu2 %v1257_v30  ;;  %532 = vmatpush.msra.mxu3 %v1258_v31  ;;  %v1235_v48 = vld [vmem:[%s2673_s2 + $0x260] sm:$0xff]  ;;  %v1236_v49 = vld [vmem:[%s2673_s2 + $0x268] sm:$0xff]  ;;  %v1237_v50 = vld [vmem:[%s2673_s2 + $0x270] sm:$0xff] }
  0x28   : > { %464 = vmatpush.msra.mxu0 %v1251_v32  ;;  %487 = vmatpush.msra.mxu1 %v1252_v33  ;;  %v1238_v51 = vld [vmem:[%s2673_s2 + $0x278] sm:$0xff]  ;;  %v1231_v52 = vld [vmem:[%s2673_s2 + $0x240] sm:$0xff]  ;;  %v1232_v53 = vld [vmem:[%s2673_s2 + $0x248] sm:$0xff] }
  0x29   : > { %510 = vmatpush.msra.mxu2 %v1253_v34  ;;  %533 = vmatpush.msra.mxu3 %v1254_v35  ;;  %v1233_v54 = vld [vmem:[%s2673_s2 + $0x250] sm:$0xff]  ;;  %v1234_v55 = vld [vmem:[%s2673_s2 + $0x258] sm:$0xff]  ;;  %v1227_v56 = vld [vmem:[%s2673_s2 + $0x220] sm:$0xff] }
  0x2a   : > { %465 = vmatpush.msra.mxu0 %v1247_v36  ;;  %488 = vmatpush.msra.mxu1 %v1248_v37  ;;  %v1228_v57 = vld [vmem:[%s2673_s2 + $0x228] sm:$0xff]  ;;  %v1229_v58 = vld [vmem:[%s2673_s2 + $0x230] sm:$0xff]  ;;  %v1230_v59 = vld [vmem:[%s2673_s2 + $0x238] sm:$0xff] }
  0x2b   : > { %511 = vmatpush.msra.mxu2 %v1249_v38  ;;  %534 = vmatpush.msra.mxu3 %v1250_v39  ;;  %v1223_v60 = vld [vmem:[%s2673_s2 + $0x200] sm:$0xff]  ;;  %v1224_v61 = vld [vmem:[%s2673_s2 + $0x208] sm:$0xff]  ;;  %v1225_v62 = vld [vmem:[%s2673_s2 + $0x210] sm:$0xff] }
  0x2c   : > { %466 = vmatpush.msra.mxu0 %v1243_v40  ;;  %489 = vmatpush.msra.mxu1 %v1244_v41  ;;  %v1226_v63 = vld [vmem:[%s2673_s2 + $0x218] sm:$0xff]  ;;  %v379_v0 = vld [vmem:[%s2673_s2 + $0x1e0] sm:$0xff]  ;;  %v380_v1 = vld [vmem:[%s2673_s2 + $0x1e8] sm:$0xff] }
  0x2d   : > { %512 = vmatpush.msra.mxu2 %v1245_v42  ;;  %535 = vmatpush.msra.mxu3 %v1246_v43  ;;  %v381_v2 = vld [vmem:[%s2673_s2 + $0x1f0] sm:$0xff]  ;;  %v382_v3 = vld [vmem:[%s2673_s2 + $0x1f8] sm:$0xff]  ;;  %v375_v4 = vld [vmem:[%s2673_s2 + $0x1c0] sm:$0xff] }
  0x2e   : > { %467 = vmatpush.msra.mxu0 %v1239_v44  ;;  %490 = vmatpush.msra.mxu1 %v1240_v45  ;;  %v376_v5 = vld [vmem:[%s2673_s2 + $0x1c8] sm:$0xff]  ;;  %v308_v6 = vld [vmem:[%s297_s14] sm:$0xff]  ;;  %v377_v8 = vld [vmem:[%s2673_s2 + $0x1d0] sm:$0xff] }
  0x2f   : > { %513 = vmatpush.msra.mxu2 %v1241_v46  ;;  %536 = vmatpush.msra.mxu3 %v1242_v47  ;;  %v309_v7 = vld [vmem:[%s1914_s7 + $0x3] sm:$0x7]  ;;  %v378_v9 = vld [vmem:[%s2673_s2 + $0x1d8] sm:$0xff]  ;;  %v372_v11 = vld [vmem:[%s2673_s2 + $0x1a8] sm:$0xff]  ;;  %v311_v14 = vrot.slane %v308_v6, 5 }
  0x30   : > { %468 = vmatpush.msra.mxu0 %v1235_v48  ;;  %491 = vmatpush.msra.mxu1 %v1236_v49  ;;  %v371_v10 = vld [vmem:[%s2673_s2 + $0x1a0] sm:$0xff]  ;;  %v373_v12 = vld [vmem:[%s2673_s2 + $0x1b0] sm:$0xff]  ;;  %v374_v13 = vld [vmem:[%s2673_s2 + $0x1b8] sm:$0xff]  ;;  %v314_v15 = vrot.slane %v309_v7, 5 }
  0x31   : > { %514 = vmatpush.msra.mxu2 %v1237_v50  ;;  %537 = vmatpush.msra.mxu3 %v1238_v51  ;;  %v367_v16 = vld [vmem:[%s2673_s2 + $0x180] sm:$0xff]  ;;  %v368_v17 = vld [vmem:[%s2673_s2 + $0x188] sm:$0xff]  ;;  %v369_v19 = vld [vmem:[%s2673_s2 + $0x190] sm:$0xff] }
  0x32   : > { %469 = vmatpush.msra.mxu0 %v1231_v52  ;;  %492 = vmatpush.msra.mxu1 %v1232_v53  ;;  %v307_v18 = vld [vmem:[%s1914_s7] sm:$0x7]  ;;  %v370_v20 = vld [vmem:[%s2673_s2 + $0x198] sm:$0xff]  ;;  %v364_v22 = vld [vmem:[%s2673_s2 + $0x168] sm:$0xff]  ;;  %v1980_v26 = vsel %vm316_vm0, %v311_v14, %v314_v15  ;;  %s1419_s7 = sshll.u32 %s1581_s25, 1 }
  0x33   : > { %515 = vmatpush.msra.mxu2 %v1233_v54  ;;  %538 = vmatpush.msra.mxu3 %v1234_v55  ;;  %v363_v21 = vld [vmem:[%s2673_s2 + $0x160] sm:$0xff]  ;;  %v365_v23 = vld [vmem:[%s2673_s2 + $0x170] sm:$0xff]  ;;  %v366_v24 = vld [vmem:[%s2673_s2 + $0x178] sm:$0xff]  ;;  %v1978_v25 = vsel %vm316_vm0, %v307_v18, %v311_v14  ;;  %v2002_v34 = vrot.slane %v1980_v26, 1  ;;  %s1109_s13 = sadd.s32 %s1577_s24, %s1419_s7  ;;  %s1099_s24 = scalar_lea.sflag [#allocation3], %s287_s16 }
  0x34   : > { %470 = vmatpush.msra.mxu0 %v1227_v56  ;;  %493 = vmatpush.msra.mxu1 %v1228_v57  ;;  %v359_v27 = vld [vmem:[%s2673_s2 + $0x140] sm:$0xff]  ;;  %v360_v28 = vld [vmem:[%s2673_s2 + $0x148] sm:$0xff]  ;;  %v361_v29 = vld [vmem:[%s2673_s2 + $0x150] sm:$0xff]  ;;  %v451_v33 = vrot.slane %v1978_v25, 1  ;;  %s1420_s19 = sshll.u32 %s1109_s13, 3  ;;  %s1519_s13 = scalar_lea.hbm %s2677_s6, 32 }
  0x35   : > { %516 = vmatpush.msra.mxu2 %v1229_v58  ;;  %539 = vmatpush.msra.mxu3 %v1230_v59  ;;  %v362_v30 = vld [vmem:[%s2673_s2 + $0x158] sm:$0xff]  ;;  %v355_v31 = vld [vmem:[%s2673_s2 + $0x120] sm:$0xff]  ;;  %v356_v32 = vld [vmem:[%s2673_s2 + $0x128] sm:$0xff]  ;;  %s1111_s8 = scalar_lea.hbm %s2677_s6, %s1420_s19 }
  0x36   : > { %471 = vmatpush.msra.mxu0 %v1223_v60  ;;  %494 = vmatpush.msra.mxu1 %v1224_v61  ;;  %v357_v35 = vld [vmem:[%s2673_s2 + $0x130] sm:$0xff]  ;;  %v358_v36 = vld [vmem:[%s2673_s2 + $0x138] sm:$0xff]  ;;  %v351_v37 = vld [vmem:[%s2673_s2 + $0x100] sm:$0xff]  ;;  %v453_v41 = vsel %vm450_vm1, %v451_v33, %v2002_v34 }
  0x37   : > { %517 = vmatpush.msra.mxu2 %v1225_v62  ;;  %540 = vmatpush.msra.mxu3 %v1226_v63  ;;  %v352_v38 = vld [vmem:[%s2673_s2 + $0x108] sm:$0xff]  ;;  %v353_v39 = vld [vmem:[%s2673_s2 + $0x110] sm:$0xff]  ;;  %v354_v40 = vld [vmem:[%s2673_s2 + $0x118] sm:$0xff] }
  0x38   : > { %548 = vmatpush.msrb.mxu0 %v379_v0  ;;  %571 = vmatpush.msrb.mxu1 %v380_v1  ;;  %v347_v42 = vld [vmem:[%s2673_s2 + $0xe0] sm:$0xff]  ;;  %v348_v43 = vld [vmem:[%s2673_s2 + $0xe8] sm:$0xff]  ;;  %v349_v44 = vld [vmem:[%s2673_s2 + $0xf0] sm:$0xff] }
  0x39   : > { %594 = vmatpush.msrb.mxu2 %v381_v2  ;;  %617 = vmatpush.msrb.mxu3 %v382_v3  ;;  %v350_v45 = vld [vmem:[%s2673_s2 + $0xf8] sm:$0xff]  ;;  %v343_v46 = vld [vmem:[%s2673_s2 + $0xc0] sm:$0xff]  ;;  %v344_v47 = vld [vmem:[%s2673_s2 + $0xc8] sm:$0xff] }
  0x3a   : > { %549 = vmatpush.msrb.mxu0 %v375_v4  ;;  %572 = vmatpush.msrb.mxu1 %v376_v5  ;;  %v345_v48 = vld [vmem:[%s2673_s2 + $0xd0] sm:$0xff]  ;;  %v346_v49 = vld [vmem:[%s2673_s2 + $0xd8] sm:$0xff]  ;;  %v339_v50 = vld [vmem:[%s2673_s2 + $0xa0] sm:$0xff] }
  0x3b   : > { %595 = vmatpush.msrb.mxu2 %v377_v8  ;;  %618 = vmatpush.msrb.mxu3 %v378_v9  ;;  %v340_v51 = vld [vmem:[%s2673_s2 + $0xa8] sm:$0xff]  ;;  %v341_v52 = vld [vmem:[%s2673_s2 + $0xb0] sm:$0xff]  ;;  %v342_v53 = vld [vmem:[%s2673_s2 + $0xb8] sm:$0xff] }
  0x3c   : > { %550 = vmatpush.msrb.mxu0 %v371_v10  ;;  %573 = vmatpush.msrb.mxu1 %v372_v11  ;;  %v335_v54 = vld [vmem:[%s2673_s2 + $0x80] sm:$0xff]  ;;  %v336_v55 = vld [vmem:[%s2673_s2 + $0x88] sm:$0xff]  ;;  %v337_v56 = vld [vmem:[%s2673_s2 + $0x90] sm:$0xff] }
  0x3d   : > { %596 = vmatpush.msrb.mxu2 %v373_v12  ;;  %619 = vmatpush.msrb.mxu3 %v374_v13  ;;  %v338_v57 = vld [vmem:[%s2673_s2 + $0x98] sm:$0xff]  ;;  %v331_v58 = vld [vmem:[%s2673_s2 + $0x60] sm:$0xff]  ;;  %v332_v59 = vld [vmem:[%s2673_s2 + $0x68] sm:$0xff] }
  0x3e   : > { %551 = vmatpush.msrb.mxu0 %v367_v16  ;;  %574 = vmatpush.msrb.mxu1 %v368_v17  ;;  %v333_v60 = vld [vmem:[%s2673_s2 + $0x70] sm:$0xff]  ;;  %v334_v61 = vld [vmem:[%s2673_s2 + $0x78] sm:$0xff]  ;;  %v327_v62 = vld [vmem:[%s2673_s2 + $0x40] sm:$0xff] }
  0x3f   : > { %597 = vmatpush.msrb.mxu2 %v369_v19  ;;  %620 = vmatpush.msrb.mxu3 %v370_v20  ;;  %v328_v63 = vld [vmem:[%s2673_s2 + $0x48] sm:$0xff]  ;;  %v329_v0 = vld [vmem:[%s2673_s2 + $0x50] sm:$0xff]  ;;  %v330_v1 = vld [vmem:[%s2673_s2 + $0x58] sm:$0xff] }
  0x40   : > { %552 = vmatpush.msrb.mxu0 %v363_v21  ;;  %575 = vmatpush.msrb.mxu1 %v364_v22  ;;  %v323_v2 = vld [vmem:[%s2673_s2 + $0x20] sm:$0xff]  ;;  %v324_v3 = vld [vmem:[%s2673_s2 + $0x28] sm:$0xff]  ;;  %v325_v4 = vld [vmem:[%s2673_s2 + $0x30] sm:$0xff] }
  0x41   : > { %598 = vmatpush.msrb.mxu2 %v365_v23  ;;  %621 = vmatpush.msrb.mxu3 %v366_v24  ;;  %v326_v5 = vld [vmem:[%s2673_s2 + $0x38] sm:$0xff]  ;;  %v319_v6 = vld [vmem:[%s2673_s2] sm:$0xff]  ;;  %v320_v7 = vld [vmem:[%s2673_s2 + $0x8] sm:$0xff] }
  0x42   : > { %553 = vmatpush.msrb.mxu0 %v359_v27  ;;  %576 = vmatpush.msrb.mxu1 %v360_v28  ;;  %v321_v8 = vld [vmem:[%s2673_s2 + $0x10] sm:$0xff]  ;;  %v322_v9 = vld [vmem:[%s2673_s2 + $0x18] sm:$0xff]  ;;  %v1347_v10 = vld [vmem:[%s2673_s2 + $0x5e0] sm:$0xff] }
  0x43   : > { %599 = vmatpush.msrb.mxu2 %v361_v29  ;;  %622 = vmatpush.msrb.mxu3 %v362_v30  ;;  %v1348_v11 = vld [vmem:[%s2673_s2 + $0x5e8] sm:$0xff]  ;;  %v1349_v12 = vld [vmem:[%s2673_s2 + $0x5f0] sm:$0xff]  ;;  %v1350_v13 = vld [vmem:[%s2673_s2 + $0x5f8] sm:$0xff] }
  0x44   : > { %554 = vmatpush.msrb.mxu0 %v355_v31  ;;  %577 = vmatpush.msrb.mxu1 %v356_v32  ;;  %v1343_v14 = vld [vmem:[%s2673_s2 + $0x5c0] sm:$0xff]  ;;  %v1344_v15 = vld [vmem:[%s2673_s2 + $0x5c8] sm:$0xff]  ;;  %v1345_v16 = vld [vmem:[%s2673_s2 + $0x5d0] sm:$0xff] }
  0x45   : > { %600 = vmatpush.msrb.mxu2 %v357_v35  ;;  %623 = vmatpush.msrb.mxu3 %v358_v36  ;;  %v1346_v17 = vld [vmem:[%s2673_s2 + $0x5d8] sm:$0xff]  ;;  %v1339_v18 = vld [vmem:[%s2673_s2 + $0x5a0] sm:$0xff]  ;;  %v1340_v19 = vld [vmem:[%s2673_s2 + $0x5a8] sm:$0xff] }
  0x46   : > { %555 = vmatpush.msrb.mxu0 %v351_v37  ;;  %578 = vmatpush.msrb.mxu1 %v352_v38  ;;  %v1341_v20 = vld [vmem:[%s2673_s2 + $0x5b0] sm:$0xff]  ;;  %v1342_v21 = vld [vmem:[%s2673_s2 + $0x5b8] sm:$0xff]  ;;  %v1335_v22 = vld [vmem:[%s2673_s2 + $0x580] sm:$0xff] }
  0x47   : > { %601 = vmatpush.msrb.mxu2 %v353_v39  ;;  %624 = vmatpush.msrb.mxu3 %v354_v40  ;;  %v1336_v23 = vld [vmem:[%s2673_s2 + $0x588] sm:$0xff]  ;;  %v1337_v24 = vld [vmem:[%s2673_s2 + $0x590] sm:$0xff]  ;;  %v1338_v27 = vld [vmem:[%s2673_s2 + $0x598] sm:$0xff] }
  0x48   : > { %518 = vmatmul.f32.vlgmr.msra.gmra.mxu2 %v453_v41  ;;  %541 = vmatmul.f32.vlgmr.msra.gmra.mxu3 %v453_v41  ;;  %v1331_v28 = vld [vmem:[%s2673_s2 + $0x560] sm:$0xff]  ;;  %v1332_v29 = vld [vmem:[%s2673_s2 + $0x568] sm:$0xff]  ;;  %v1333_v30 = vld [vmem:[%s2673_s2 + $0x570] sm:$0xff] }
  0x49   : > { %556 = vmatpush.msrb.mxu0 %v347_v42  ;;  %579 = vmatpush.msrb.mxu1 %v348_v43  ;;  %v1334_v31 = vld [vmem:[%s2673_s2 + $0x578] sm:$0xff]  ;;  %v1327_v32 = vld [vmem:[%s2673_s2 + $0x540] sm:$0xff]  ;;  %v1328_v33 = vld [vmem:[%s2673_s2 + $0x548] sm:$0xff] }
  0x4a   : > { %602 = vmatpush.msrb.mxu2 %v349_v44  ;;  %625 = vmatpush.msrb.mxu3 %v350_v45  ;;  %v1330_v35 = vld [vmem:[%s2673_s2 + $0x558] sm:$0xff]  ;;  %v1323_v36 = vld [vmem:[%s2673_s2 + $0x520] sm:$0xff]  ;;  %v1324_v37 = vld [vmem:[%s2673_s2 + $0x528] sm:$0xff] }
  0x4b   : > { %472 = vmatmul.f32.vlgmr.msra.gmra.mxu0 %v453_v41  ;;  %495 = vmatmul.f32.vlgmr.msra.gmra.mxu1 %v453_v41  ;;  %v1325_v38 = vld [vmem:[%s2673_s2 + $0x530] sm:$0xff]  ;;  %v1326_v39 = vld [vmem:[%s2673_s2 + $0x538] sm:$0xff]  ;;  %v1319_v40 = vld [vmem:[%s2673_s2 + $0x500] sm:$0xff] }
  0x4c   : > { %557 = vmatpush.msrb.mxu0 %v343_v46  ;;  %580 = vmatpush.msrb.mxu1 %v344_v47  ;;  %v1320_v41 = vld [vmem:[%s2673_s2 + $0x508] sm:$0xff]  ;;  %v1321_v42 = vld [vmem:[%s2673_s2 + $0x510] sm:$0xff]  ;;  %v1322_v43 = vld [vmem:[%s2673_s2 + $0x518] sm:$0xff] }
  0x4d   : > { %603 = vmatpush.msrb.mxu2 %v345_v48  ;;  %626 = vmatpush.msrb.mxu3 %v346_v49  ;;  %v1315_v44 = vld [vmem:[%s2673_s2 + $0x4e0] sm:$0xff]  ;;  %v1316_v45 = vld [vmem:[%s2673_s2 + $0x4e8] sm:$0xff]  ;;  %v1317_v46 = vld [vmem:[%s2673_s2 + $0x4f0] sm:$0xff] }
  0x4e   : > { %558 = vmatpush.msrb.mxu0 %v339_v50  ;;  %581 = vmatpush.msrb.mxu1 %v340_v51  ;;  %v1318_v47 = vld [vmem:[%s2673_s2 + $0x4f8] sm:$0xff]  ;;  %v1311_v48 = vld [vmem:[%s2673_s2 + $0x4c0] sm:$0xff]  ;;  %v1312_v49 = vld [vmem:[%s2673_s2 + $0x4c8] sm:$0xff] }
  0x4f   : > { %604 = vmatpush.msrb.mxu2 %v341_v52  ;;  %627 = vmatpush.msrb.mxu3 %v342_v53  ;;  %v1313_v50 = vld [vmem:[%s2673_s2 + $0x4d0] sm:$0xff]  ;;  %v1314_v51 = vld [vmem:[%s2673_s2 + $0x4d8] sm:$0xff]  ;;  %v1307_v52 = vld [vmem:[%s2673_s2 + $0x4a0] sm:$0xff] }
  0x50   : > { %559 = vmatpush.msrb.mxu0 %v335_v54  ;;  %582 = vmatpush.msrb.mxu1 %v336_v55  ;;  %v1308_v53 = vld [vmem:[%s2673_s2 + $0x4a8] sm:$0xff]  ;;  %v1309_v54 = vld [vmem:[%s2673_s2 + $0x4b0] sm:$0xff]  ;;  %v1310_v55 = vld [vmem:[%s2673_s2 + $0x4b8] sm:$0xff] }
  0x51   : > { %605 = vmatpush.msrb.mxu2 %v337_v56  ;;  %628 = vmatpush.msrb.mxu3 %v338_v57  ;;  %v1303_v56 = vld [vmem:[%s2673_s2 + $0x480] sm:$0xff]  ;;  %v1304_v57 = vld [vmem:[%s2673_s2 + $0x488] sm:$0xff] }
  0x52   : > { %521 = vmatmul.f32.gmra.mxu2 %v2002_v34  ;;  %544 = vmatmul.f32.gmra.mxu3 %v2002_v34 }
  0x53   : > { %560 = vmatpush.msrb.mxu0 %v331_v58  ;;  %583 = vmatpush.msrb.mxu1 %v332_v59  ;;  %v1305_v58 = vld [vmem:[%s2673_s2 + $0x490] sm:$0xff]  ;;  %v1306_v59 = vld [vmem:[%s2673_s2 + $0x498] sm:$0xff] }
  0x54   : > { %606 = vmatpush.msrb.mxu2 %v333_v60  ;;  %629 = vmatpush.msrb.mxu3 %v334_v61  ;;  %v1299_v60 = vld [vmem:[%s2673_s2 + $0x460] sm:$0xff]  ;;  %v1300_v61 = vld [vmem:[%s2673_s2 + $0x468] sm:$0xff] }
  0x55   : > { %475 = vmatmul.f32.gmra.mxu0 %v2002_v34  ;;  %498 = vmatmul.f32.gmra.mxu1 %v2002_v34  ;;  %v1329_v34 = vld [vmem:[%s2673_s2 + $0x550] sm:$0xff] }
  0x56   : > { %561 = vmatpush.msrb.mxu0 %v327_v62  ;;  %584 = vmatpush.msrb.mxu1 %v328_v63  ;;  %v1301_v62 = vld [vmem:[%s2673_s2 + $0x470] sm:$0xff]  ;;  %v1302_v63 = vld [vmem:[%s2673_s2 + $0x478] sm:$0xff] }
  0x57   : > { %607 = vmatpush.msrb.mxu2 %v329_v0  ;;  %630 = vmatpush.msrb.mxu3 %v330_v1  ;;  %v1295_v0 = vld [vmem:[%s2673_s2 + $0x440] sm:$0xff]  ;;  %v1296_v1 = vld [vmem:[%s2673_s2 + $0x448] sm:$0xff] }
  0x58   : > { %562 = vmatpush.msrb.mxu0 %v323_v2  ;;  %585 = vmatpush.msrb.mxu1 %v324_v3  ;;  %v1297_v2 = vld [vmem:[%s2673_s2 + $0x450] sm:$0xff]  ;;  %v1298_v3 = vld [vmem:[%s2673_s2 + $0x458] sm:$0xff] }
  0x59   : > { %608 = vmatpush.msrb.mxu2 %v325_v4  ;;  %631 = vmatpush.msrb.mxu3 %v326_v5  ;;  %v1291_v4 = vld [vmem:[%s2673_s2 + $0x420] sm:$0xff]  ;;  %v1292_v5 = vld [vmem:[%s2673_s2 + $0x428] sm:$0xff] }
  0x5a   : > { %563 = vmatpush.msrb.mxu0 %v319_v6  ;;  %586 = vmatpush.msrb.mxu1 %v320_v7  ;;  %v706_v6 = vrot.slane %v1978_v25, 2  ;;  %v707_v7 = vrot.slane %v1980_v26, 2 }
  0x5b   : > { %609 = vmatpush.msrb.mxu2 %v321_v8  ;;  %632 = vmatpush.msrb.mxu3 %v322_v9  ;;  %v1293_v8 = vld [vmem:[%s2673_s2 + $0x430] sm:$0xff]  ;;  %v1294_v9 = vld [vmem:[%s2673_s2 + $0x438] sm:$0xff] }
  0x5c   : > { %610 = vmatmul.f32.vlgmr.msrb.gmra.mxu2 %v1978_v25  ;;  %711 = vmatpush.msra.mxu0 %v1347_v10  ;;  %v1287_v10 = vld [vmem:[%s2673_s2 + $0x400] sm:$0xff] }
  0x5d   : > { %734 = vmatpush.msra.mxu1 %v1348_v11  ;;  %757 = vmatpush.msra.mxu2 %v1349_v12  ;;  %v1290_v11 = vld [vmem:[%s2673_s2 + $0x418] sm:$0xff]  ;;  %v708_v12 = vsel %vm705_vm2, %v706_v6, %v707_v7 }
  0x5e   : > { %780 = vmatpush.msra.mxu3 %v1350_v13  ;;  %712 = vmatpush.msra.mxu0 %v1343_v14  ;;  %v1369_v13 = vld [vmem:[%s2675_s4 + $0xf8] sm:$0xff]  ;;  %v1368_v14 = vld [vmem:[%s2675_s4 + $0xf0] sm:$0xff] }
  0x5f   : > { %633 = vmatmul.f32.vlgmr.msrb.gmra.mxu3 %v1978_v25  ;;  %735 = vmatpush.msra.mxu1 %v1344_v15  ;;  %v1367_v15 = vld [vmem:[%s2675_s4 + $0xe8] sm:$0xff]  ;;  %v873_v6 = vld [vmem:[%s2675_s4 + $0x18] sm:$0xff] }
  0x60   : > { %758 = vmatpush.msra.mxu2 %v1345_v16  ;;  %781 = vmatpush.msra.mxu3 %v1346_v17  ;;  %v1366_v16 = vld [vmem:[%s2675_s4 + $0xe0] sm:$0xff]  ;;  %v1365_v17 = vld [vmem:[%s2675_s4 + $0xd8] sm:$0xff] }
  0x61   : > { %564 = vmatmul.f32.vlgmr.msrb.gmra.mxu0 %v1978_v25  ;;  %587 = vmatmul.f32.vlgmr.msrb.gmra.mxu1 %v1978_v25  ;;  %v1288_v25 = vld [vmem:[%s2673_s2 + $0x408] sm:$0xff] }
  0x62   : > { %713 = vmatpush.msra.mxu0 %v1339_v18  ;;  %736 = vmatpush.msra.mxu1 %v1340_v19  ;;  %v885_v18 = vld [vmem:[%s2675_s4 + $0x78] sm:$0xff]  ;;  %v1364_v19 = vld [vmem:[%s2675_s4 + $0xd0] sm:$0xff] }
  0x63   : > { %759 = vmatpush.msra.mxu2 %v1341_v20  ;;  %782 = vmatpush.msra.mxu3 %v1342_v21  ;;  %v884_v20 = vld [vmem:[%s2675_s4 + $0x70] sm:$0xff]  ;;  %v883_v21 = vld [vmem:[%s2675_s4 + $0x68] sm:$0xff] }
  0x64   : > { %714 = vmatpush.msra.mxu0 %v1335_v22  ;;  %737 = vmatpush.msra.mxu1 %v1336_v23  ;;  %v1363_v22 = vld [vmem:[%s2675_s4 + $0xc8] sm:$0xff]  ;;  %v882_v23 = vld [vmem:[%s2675_s4 + $0x60] sm:$0xff] }
  0x65   : > { %760 = vmatpush.msra.mxu2 %v1337_v24  ;;  %783 = vmatpush.msra.mxu3 %v1338_v27  ;;  %v1362_v24 = vld [vmem:[%s2675_s4 + $0xc0] sm:$0xff]  ;;  %v881_v27 = vld [vmem:[%s2675_s4 + $0x58] sm:$0xff] }
  0x66   : > { %613 = vmatmul.f32.gmra.mxu2 %v1980_v26  ;;  %715 = vmatpush.msra.mxu0 %v1331_v28  ;;  %v1361_v28 = vld [vmem:[%s2675_s4 + $0xb8] sm:$0xff] }
  0x67   : > { %738 = vmatpush.msra.mxu1 %v1332_v29  ;;  %761 = vmatpush.msra.mxu2 %v1333_v30 }
  0x68   : > { %784 = vmatpush.msra.mxu3 %v1334_v31  ;;  %716 = vmatpush.msra.mxu0 %v1327_v32  ;;  %v1360_v31 = vld [vmem:[%s2675_s4 + $0xb0] sm:$0xff]  ;;  %v1359_v32 = vld [vmem:[%s2675_s4 + $0xa8] sm:$0xff] }
  0x69   : > { %636 = vmatmul.f32.gmra.mxu3 %v1980_v26  ;;  %739 = vmatpush.msra.mxu1 %v1328_v33  ;;  %v1358_v33 = vld [vmem:[%s2675_s4 + $0xa0] sm:$0xff] }
  0x6a   : > { %762 = vmatpush.msra.mxu2 %v1329_v34  ;;  %785 = vmatpush.msra.mxu3 %v1330_v35  ;;  %v880_v34 = vld [vmem:[%s2675_s4 + $0x50] sm:$0xff] }
  0x6b   : > { %567 = vmatmul.f32.gmra.mxu0 %v1980_v26  ;;  %590 = vmatmul.f32.gmra.mxu1 %v1980_v26  ;;  %v1289_v26 = vld [vmem:[%s2673_s2 + $0x410] sm:$0xff] }
  0x6c   : > { %717 = vmatpush.msra.mxu0 %v1323_v36  ;;  %740 = vmatpush.msra.mxu1 %v1324_v37  ;;  %v1401_v37 = vld [vmem:[%s2675_s4 + $0x1f8] sm:$0xff] }
  0x6d   : > { %763 = vmatpush.msra.mxu2 %v1325_v38  ;;  %786 = vmatpush.msra.mxu3 %v1326_v39  ;;  %v1385_v38 = vld [vmem:[%s2675_s4 + $0x178] sm:$0xff] }
  0x6e   : > { %718 = vmatpush.msra.mxu0 %v1319_v40  ;;  %741 = vmatpush.msra.mxu1 %v1320_v41  ;;  %v1357_v39 = vld [vmem:[%s2675_s4 + $0x98] sm:$0xff]  ;;  %v879_v40 = vld [vmem:[%s2675_s4 + $0x48] sm:$0xff]  ;;  %v1400_v41 = vld [vmem:[%s2675_s4 + $0x1f0] sm:$0xff] }
  0x6f   : > { %764 = vmatpush.msra.mxu2 %v1321_v42  ;;  %787 = vmatpush.msra.mxu3 %v1322_v43  ;;  %v1384_v42 = vld [vmem:[%s2675_s4 + $0x170] sm:$0xff] }
  0x70   : > { %719 = vmatpush.msra.mxu0 %v1315_v44  ;;  %742 = vmatpush.msra.mxu1 %v1316_v45  ;;  %v1356_v45 = vld [vmem:[%s2675_s4 + $0x90] sm:$0xff] }
  0x71   : > { %765 = vmatpush.msra.mxu2 %v1317_v46  ;;  %788 = vmatpush.msra.mxu3 %v1318_v47  ;;  %v878_v46 = vld [vmem:[%s2675_s4 + $0x40] sm:$0xff]  ;;  %v1399_v47 = vld [vmem:[%s2675_s4 + $0x1e8] sm:$0xff] }
  0x72   : > { %720 = vmatpush.msra.mxu0 %v1311_v48  ;;  %743 = vmatpush.msra.mxu1 %v1312_v49  ;;  %v1383_v48 = vld [vmem:[%s2675_s4 + $0x168] sm:$0xff] }
  0x73   : > { %766 = vmatpush.msra.mxu2 %v1313_v50  ;;  %789 = vmatpush.msra.mxu3 %v1314_v51  ;;  %v1355_v49 = vld [vmem:[%s2675_s4 + $0x88] sm:$0xff]  ;;  %v877_v50 = vld [vmem:[%s2675_s4 + $0x38] sm:$0xff]  ;;  %v1398_v51 = vld [vmem:[%s2675_s4 + $0x1e0] sm:$0xff] }
  0x74   : > { %721 = vmatpush.msra.mxu0 %v1307_v52  ;;  %744 = vmatpush.msra.mxu1 %v1308_v53  ;;  %v1382_v52 = vld [vmem:[%s2675_s4 + $0x160] sm:$0xff] }
  0x75   : > { %767 = vmatpush.msra.mxu2 %v1309_v54  ;;  %790 = vmatpush.msra.mxu3 %v1310_v55  ;;  %v1354_v53 = vld [vmem:[%s2675_s4 + $0x80] sm:$0xff]  ;;  %v876_v54 = vld [vmem:[%s2675_s4 + $0x30] sm:$0xff]  ;;  %v1397_v55 = vld [vmem:[%s2675_s4 + $0x1d8] sm:$0xff] }
  0x76   : > { %722 = vmatpush.msra.mxu0 %v1303_v56  ;;  %745 = vmatpush.msra.mxu1 %v1304_v57  ;;  %v1381_v56 = vld [vmem:[%s2675_s4 + $0x158] sm:$0xff] }
  0x77   : > { %768 = vmatpush.msra.mxu2 %v1305_v58  ;;  %791 = vmatpush.msra.mxu3 %v1306_v59  ;;  %v1417_v57 = vld [vmem:[%s2675_s4 + $0x278] sm:$0xff]  ;;  %v875_v58 = vld [vmem:[%s2675_s4 + $0x28] sm:$0xff] }
  0x78   : > { %723 = vmatpush.msra.mxu0 %v1299_v60  ;;  %746 = vmatpush.msra.mxu1 %v1300_v61  ;;  %v1396_v61 = vld [vmem:[%s2675_s4 + $0x1d0] sm:$0xff] }
  0x79   : > { %769 = vmatpush.msra.mxu2 %v1301_v62  ;;  %792 = vmatpush.msra.mxu3 %v1302_v63  ;;  %v1380_v62 = vld [vmem:[%s2675_s4 + $0x150] sm:$0xff] }
  0x7a   : > { %724 = vmatpush.msra.mxu0 %v1295_v0  ;;  %747 = vmatpush.msra.mxu1 %v1296_v1  ;;  %v1416_v63 = vld [vmem:[%s2675_s4 + $0x270] sm:$0xff]  ;;  %v874_v0 = vld [vmem:[%s2675_s4 + $0x20] sm:$0xff]  ;;  %v1395_v1 = vld [vmem:[%s2675_s4 + $0x1c8] sm:$0xff] }
  0x7b   : > { %770 = vmatpush.msra.mxu2 %v1297_v2  ;;  %793 = vmatpush.msra.mxu3 %v1298_v3  ;;  %v1379_v2 = vld [vmem:[%s2675_s4 + $0x148] sm:$0xff] }
  0x7c   : > { %725 = vmatpush.msra.mxu0 %v1291_v4  ;;  %748 = vmatpush.msra.mxu1 %v1292_v5  ;;  %v1415_v3 = vld [vmem:[%s2675_s4 + $0x268] sm:$0xff] }
  0x7d   : > { %771 = vmatpush.msra.mxu2 %v1293_v8  ;;  %794 = vmatpush.msra.mxu3 %v1294_v9  ;;  %v1378_v8 = vld [vmem:[%s2675_s4 + $0x140] sm:$0xff] }
  0x7e   : > { %726 = vmatpush.msra.mxu0 %v1287_v10  ;;  %749 = vmatpush.msra.mxu1 %v1288_v25  ;;  %v1414_v9 = vld [vmem:[%s2675_s4 + $0x260] sm:$0xff]  ;;  %v872_v10 = vld [vmem:[%s2675_s4 + $0x10] sm:$0xff]  ;;  %v1393_v25 = vld [vmem:[%s2675_s4 + $0x1b8] sm:$0xff] }
  0x7f   : > { %772 = vmatpush.msra.mxu2 %v1289_v26  ;;  %795 = vmatpush.msra.mxu3 %v1290_v11  ;;  %v1377_v26 = vld [vmem:[%s2675_s4 + $0x138] sm:$0xff] }
  0x80   : > { %727 = vmatmul.f32.vlgmr.msra.gmra.mxu0 %v708_v12  ;;  %750 = vmatmul.f32.vlgmr.msra.gmra.mxu1 %v708_v12  ;;  %v1413_v11 = vld [vmem:[%s2675_s4 + $0x258] sm:$0xff] }
  0x81   : > { %773 = vmatmul.f32.vlgmr.msra.gmra.mxu2 %v708_v12  ;;  %796 = vmatmul.f32.vlgmr.msra.gmra.mxu3 %v708_v12  ;;  %v871_v12 = vld [vmem:[%s2675_s4 + $0x8] sm:$0xff] }
  0x82   : > { %909 = vmatpush.msrb.mxu0 %v1369_v13  ;;  %929 = vmatpush.msrb.mxu1 %v885_v18  ;;  %v837_v13 = vlaneseq }
  0x83   : > { %988 = vmatpush.msrb.mxu2 %v1401_v37  ;;  %1012 = vmatpush.msrb.mxu3 %v1385_v38  ;;  %v1373_v37 = vld [vmem:[%s2675_s4 + $0x118] sm:$0xff] }
  0x84   : > { %910 = vmatpush.msrb.mxu0 %v1368_v14  ;;  %930 = vmatpush.msrb.mxu1 %v884_v20  ;;  %v1392_v14 = vld [vmem:[%s2675_s4 + $0x1b0] sm:$0xff]  ;;  %v1391_v20 = vld [vmem:[%s2675_s4 + $0x1a8] sm:$0xff]  ;;  %v1409_v38 = vld [vmem:[%s2675_s4 + $0x238] sm:$0xff] }
  0x85   : > { %989 = vmatpush.msrb.mxu2 %v1400_v41  ;;  %1013 = vmatpush.msrb.mxu3 %v1384_v42  ;;  %v1388_v41 = vld [vmem:[%s2675_s4 + $0x190] sm:$0xff] }
  0x86   : > { %911 = vmatpush.msrb.mxu0 %v1367_v15  ;;  %931 = vmatpush.msrb.mxu1 %v883_v21  ;;  %v1376_v15 = vld [vmem:[%s2675_s4 + $0x130] sm:$0xff]  ;;  %v1375_v21 = vld [vmem:[%s2675_s4 + $0x128] sm:$0xff] }
  0x87   : > { %990 = vmatpush.msrb.mxu2 %v1399_v47  ;;  %1014 = vmatpush.msrb.mxu3 %v1383_v48  ;;  %v1372_v42 = vld [vmem:[%s2675_s4 + $0x110] sm:$0xff]  ;;  %v1371_v47 = vld [vmem:[%s2675_s4 + $0x108] sm:$0xff] }
  0x88   : > { %730 = vmatmul.f32.gmra.mxu0 %v707_v7  ;;  %753 = vmatmul.f32.gmra.mxu1 %v707_v7  ;;  %v1407_v48 = vld [vmem:[%s2675_s4 + $0x228] sm:$0xff] }
  0x89   : > { %776 = vmatmul.f32.gmra.mxu2 %v707_v7  ;;  %799 = vmatmul.f32.gmra.mxu3 %v707_v7  ;;  %v1394_v7 = vld [vmem:[%s2675_s4 + $0x1c0] sm:$0xff] }
  0x8a   : > { %912 = vmatpush.msrb.mxu0 %v1366_v16  ;;  %932 = vmatpush.msrb.mxu1 %v882_v23  ;;  %v1412_v16 = vld [vmem:[%s2675_s4 + $0x250] sm:$0xff]  ;;  %v838_v23 = vshrl.u32 %v837_v13, 7 }
  0x8b   : > { %991 = vmatpush.msrb.mxu2 %v1398_v51  ;;  %1015 = vmatpush.msrb.mxu3 %v1382_v52 }
  0x8c   : > { %913 = vmatpush.msrb.mxu0 %v1365_v17  ;;  %933 = vmatpush.msrb.mxu1 %v881_v27  ;;  %v870_v17 = vld [vmem:[%s2675_s4] sm:$0xff] }
  0x8d   : > { %992 = vmatpush.msrb.mxu2 %v1397_v55  ;;  %1016 = vmatpush.msrb.mxu3 %v1381_v56  ;;  %v1374_v27 = vld [vmem:[%s2675_s4 + $0x120] sm:$0xff] }
  0x8e   : > { %914 = vmatpush.msrb.mxu0 %v1364_v19  ;;  %934 = vmatpush.msrb.mxu1 %v880_v34  ;;  %v1389_v34 = vld [vmem:[%s2675_s4 + $0x198] sm:$0xff] }
  0x8f   : > { %993 = vmatpush.msrb.mxu2 %v1396_v61  ;;  %1017 = vmatpush.msrb.mxu3 %v1380_v62 }
  0x90   : > { %915 = vmatpush.msrb.mxu0 %v1363_v22  ;;  %935 = vmatpush.msrb.mxu1 %v879_v40  ;;  %v1411_v22 = vld [vmem:[%s2675_s4 + $0x248] sm:$0xff] }
  0x91   : > { %994 = vmatpush.msrb.mxu2 %v1395_v1  ;;  %1018 = vmatpush.msrb.mxu3 %v1379_v2 }
  0x92   : > { %916 = vmatpush.msrb.mxu0 %v1362_v24  ;;  %936 = vmatpush.msrb.mxu1 %v878_v46  ;;  %v1390_v24 = vld [vmem:[%s2675_s4 + $0x1a0] sm:$0xff]  ;;  %v1387_v46 = vld [vmem:[%s2675_s4 + $0x188] sm:$0xff] }
  0x93   : > { %995 = vmatpush.msrb.mxu2 %v1394_v7  ;;  %1019 = vmatpush.msrb.mxu3 %v1378_v8  ;;  %v1595_v7 = vmov 0.0  }
  0x94   : > { %917 = vmatpush.msrb.mxu0 %v1361_v28  ;;  %937 = vmatpush.msrb.mxu1 %v877_v50  ;;  %v1410_v28 = vld [vmem:[%s2675_s4 + $0x240] sm:$0xff] }
  0x95   : > { %996 = vmatpush.msrb.mxu2 %v1393_v25  ;;  %1020 = vmatpush.msrb.mxu3 %v1377_v26  ;;  %v1370_v50 = vld [vmem:[%s2675_s4 + $0x100] sm:$0xff] }
  0x96   : > { %918 = vmatpush.msrb.mxu0 %v1360_v31  ;;  %938 = vmatpush.msrb.mxu1 %v876_v54  ;;  %v1406_v54 = vld [vmem:[%s2675_s4 + $0x220] sm:$0xff] }
  0x97   : > { %997 = vmatpush.msrb.mxu2 %v1392_v14  ;;  %1021 = vmatpush.msrb.mxu3 %v1376_v15 }
  0x98   : > { %919 = vmatpush.msrb.mxu0 %v1359_v32  ;;  %939 = vmatpush.msrb.mxu1 %v875_v58  ;;  %v839_v58 = vadd.s32 8, %v838_v23 }
  0x99   : > { %998 = vmatpush.msrb.mxu2 %v1391_v20  ;;  %1022 = vmatpush.msrb.mxu3 %v1375_v21 }
  0x9a   : > { %920 = vmatpush.msrb.mxu0 %v1358_v33  ;;  %940 = vmatpush.msrb.mxu1 %v874_v0  ;;  %v841_v33 = vstv %s2526_s18  ;;  %v1404_v0 = vld [vmem:[%s2675_s4 + $0x210] sm:$0xff]  ;;  %s289_s18 = scalar_lea.vmem [#allocation2], %s1217_s17 }
  0x9b   : > { %999 = vmatpush.msrb.mxu2 %v1390_v24  ;;  %1023 = vmatpush.msrb.mxu3 %v1374_v27  ;;  %v842_v40 = vadd.s32 %v841_v33, %v838_v23  ;;  %s1113_s14 = sshll.u32 %s289_s18, 4  ;;  %s1114_s14 = int_to_ptr.vmem [resolvable:$true] %s1113_s14 }
  0x9c   : > { %921 = vmatpush.msrb.mxu0 %v1357_v39  ;;  %941 = vmatpush.msrb.mxu1 %v873_v6  ;;  %v2563_v39 = vld [vmem:[%s2674_s3] sm:$0xf] }
  0x9d   : > { %1000 = vmatpush.msrb.mxu2 %v1389_v34  ;;  %1024 = vmatpush.msrb.mxu3 %v1373_v37  ;;  %vm844_vm3 = vcmp.ge.s32.totalorder %v842_v40, 0  ;;  %vm846_vm4 = vcmp.lt.s32.totalorder %v842_v40, 16  ;;  %v815_v25 = vperm.slane %v2563_v39, 2  ;;  %v816_v26 = vperm.slane %v2563_v39, 3 }
  0x9e   : > { %922 = vmatpush.msrb.mxu0 %v1356_v45  ;;  %942 = vmatpush.msrb.mxu1 %v872_v10  ;;  %v1408_v45 = vld [vmem:[%s2675_s4 + $0x230] sm:$0xff]  ;;  %vm848_vm5 = vmand %vm844_vm3, %vm846_vm4 }
  0x9f   : > { %1001 = vmatpush.msrb.mxu2 %v1388_v41  ;;  %1025 = vmatpush.msrb.mxu3 %v1372_v42  ;;  %v1352_v8 = vsel %vm848_vm5, 1.0, %v1595_v7 }
  0xa0   : > { %923 = vmatpush.msrb.mxu0 %v1355_v49  ;;  %943 = vmatpush.msrb.mxu1 %v871_v12  ;;  %v1386_v49 = vld [vmem:[%s2675_s4 + $0x180] sm:$0xff] }
  0xa1   : > { %1002 = vmatpush.msrb.mxu2 %v1387_v46  ;;  %1026 = vmatpush.msrb.mxu3 %v1371_v47 }
  0xa2   : > { %924 = vmatpush.msrb.mxu0 %v1354_v53  ;;  %944 = vmatpush.msrb.mxu1 %v870_v17  ;;  %v813_v53 = vperm.slane %v2563_v39, 0 }
  0xa3   : > { %1003 = vmatpush.msrb.mxu2 %v1386_v49  ;;  %1027 = vmatpush.msrb.mxu3 %v1370_v50 }
  0xa4   : > { %1055 = vmatpush.msra.mxu0 %v1417_v57  ;;  %v814_v57 = vperm.slane %v2563_v39, 1 }
  0xa6   : > { %1056 = vmatpush.msra.mxu0 %v1416_v63  ;;  %v1405_v63 = vld [vmem:[%s2675_s4 + $0x218] sm:$0xff] }
  0xa8   : > { %1057 = vmatpush.msra.mxu0 %v1415_v3  ;;  %v843_v3 = vadd.s32 %v841_v33, %v839_v58 }
  0xaa   : > { %1058 = vmatpush.msra.mxu0 %v1414_v9  ;;  %vm845_vm6 = vcmp.ge.s32.totalorder %v843_v3, 0  ;;  %vm847_vm7 = vcmp.lt.s32.totalorder %v843_v3, 16 }
  0xab   : > { %vm849_vm8 = vmand %vm845_vm6, %vm847_vm7 }
  0xac   : > { %1059 = vmatpush.msra.mxu0 %v1413_v11  ;;  %v1402_v11 = vld [vmem:[%s2675_s4 + $0x200] sm:$0xff] }
  0xae   : > { %1060 = vmatpush.msra.mxu0 %v1412_v16 }
  0xb0   : > { %1061 = vmatpush.msra.mxu0 %v1411_v22 }
  0xb2   : > { %1062 = vmatpush.msra.mxu0 %v1410_v28 }
  0xb4   : > { %1063 = vmatpush.msra.mxu0 %v1409_v38 }
  0xb6   : > { %1064 = vmatpush.msra.mxu0 %v1408_v45 }
  0xb8   : > { %1065 = vmatpush.msra.mxu0 %v1407_v48 }
  0xba   : > { %1066 = vmatpush.msra.mxu0 %v1406_v54 }
  0xbc   : > { %1067 = vmatpush.msra.mxu0 %v1405_v63 }
  0xbe   : > { %1068 = vmatpush.msra.mxu0 %v1404_v0 }
  0xc8   : > { %v2369_v29 = vpop.f32.mrf.mxu0  ;;  %v2371_v30 = vpop.f32.mrf.mxu1 }
  0xcb   : > { %v2385_v35 = vpop.f32.mrf.mxu2  ;;  %v2387_v36 = vpop.f32.mrf.mxu3 }
  0xd2   : > { %v2407_v43 = vpop.f32.mrf.mxu0  ;;  %v2409_v44 = vpop.f32.mrf.mxu1 }
  0xd5   : > { %v2453_v59 = vpop.f32.mrf.mxu2  ;;  %v2455_v60 = vpop.f32.mrf.mxu3 }
  0xde   : > { %v2478_v4 = vpop.f32.mrf.mxu0  ;;  %v2480_v5 = vpop.f32.mrf.mxu1 }
  0xdf   : > { %v2522_v18 = vpop.f32.mrf.mxu2  ;;  %v566_v51 = vadd.f32 %v2478_v4, %v2369_v29  ;;  %v589_v52 = vadd.f32 %v2480_v5, %v2371_v30  ;;  %v1403_v4 = vld [vmem:[%s2675_s4 + $0x208] sm:$0xff] }
  0xe0   : > { %v612_v5 = vadd.f32 %v2522_v18, %v2385_v35  ;;  %1069 = vmatpush.msra.mxu0 %v1403_v4 }
  0xe2   : > { %v2524_v19 = vpop.f32.mrf.mxu3  ;;  %1070 = vmatpush.msra.mxu0 %v1402_v11 }
  0xe3   : > { %v635_v6 = vadd.f32 %v2524_v19, %v2387_v36 }
  0xe8   : > { %v2546_v31 = vpop.f32.mrf.mxu0  ;;  %v2548_v32 = vpop.f32.mrf.mxu1 }
  0xe9   : > { %v614_v55 = vpop.f32.mrf.mxu2  ;;  %v569_v12 = vadd.f32 %v2546_v31, %v2407_v43  ;;  %v592_v35 = vadd.f32 %v2548_v32, %v2409_v44  ;;  %v1353_v32 = vsel %vm849_vm8, 1.0, %v1595_v7 }
  0xea   : > { %v615_v28 = vadd.f32 %v614_v55, %v2453_v59 }
  0xec   : > { %v637_v56 = vpop.f32.mrf.mxu3 }
  0xed   : > { %v638_v33 = vadd.f32 %v637_v56, %v2455_v60 }
  0xfd   : > { %v728_v29 = vpop.f32.mrf.mxu0  ;;  %v751_v61 = vpop.f32.mrf.mxu1 }
  0xfe   : > { %v803_v30 = vadd.f32 %v728_v29, %v566_v51  ;;  %v804_v62 = vadd.f32 %v751_v61, %v589_v52 }
 0x100   : > { %v821_v1 = vadd.f32 %v813_v53, %v803_v30  ;;  %v822_v2 = vadd.f32 %v814_v57, %v804_v62 }
 0x102   : > { %v829_v9 = vmax.f32 %v821_v1, 0.0  ;;  %v830_v10 = vmax.f32 %v822_v2, 0.0 }
 0x104   : > { %v774_v36 = vpop.f32.mrf.mxu2  ;;  %v797_v13 = vpop.f32.mrf.mxu3  ;;  %v854_v20 = vmul.f32 %v1352_v8, %v829_v9  ;;  %v855_v21 = vmul.f32 %v1352_v8, %v830_v10 }
 0x105   : > { %v805_v14 = vadd.f32 %v774_v36, %v612_v5  ;;  %v806_v15 = vadd.f32 %v797_v13, %v635_v6  ;;  %v731_v16 = vpop.f32.mrf.mxu0  ;;  %v754_v17 = vpop.f32.mrf.mxu1 }
 0x106   : > { %v807_v18 = vadd.f32 %v731_v16, %v569_v12  ;;  %v808_v19 = vadd.f32 %v754_v17, %v592_v35  ;;  %v862_v34 = vadd.f32 %v855_v21, %v854_v20  ;;  %v1498_v12 = vld [vmem:[%s2676_s5] ss:$0 sm:$0xff] }
 0x107   : > { %v823_v22 = vadd.f32 %v815_v25, %v805_v14  ;;  %v824_v23 = vadd.f32 %v816_v26, %v806_v15 }
 0x108   : > { %v825_v43 = vadd.f32 %v813_v53, %v807_v18  ;;  %v826_v24 = vadd.f32 %v814_v57, %v808_v19 }
 0x109   : > { %v831_v44 = vmax.f32 %v823_v22, 0.0  ;;  %v832_v27 = vmax.f32 %v824_v23, 0.0 }
 0x10a   : > { %v833_v31 = vmax.f32 %v825_v43, 0.0  ;;  %v834_v38 = vmax.f32 %v826_v24, 0.0 }
 0x10b   : > { %v856_v37 = vmul.f32 %v1352_v8, %v831_v44  ;;  %v857_v42 = vmul.f32 %v1352_v8, %v832_v27 }
 0x10c   : > { %v777_v39 = vpop.f32.mrf.mxu2  ;;  %v800_v40 = vpop.f32.mrf.mxu3  ;;  %v858_v47 = vmul.f32 %v1353_v32, %v833_v31  ;;  %v859_v49 = vmul.f32 %v1353_v32, %v834_v38 }
 0x10d   : > { %v864_v41 = vadd.f32 %v862_v34, %v856_v37  ;;  %v809_v45 = vadd.f32 %v777_v39, %v615_v28  ;;  %v810_v46 = vadd.f32 %v800_v40, %v638_v33 }
 0x10e   : > { %v863_v54 = vadd.f32 %v859_v49, %v858_v47 }
 0x10f   : > { %v866_v48 = vadd.f32 %v864_v41, %v857_v42  ;;  %v827_v50 = vadd.f32 %v815_v25, %v809_v45  ;;  %v828_v51 = vadd.f32 %v816_v26, %v810_v46 }
 0x111   : > { %v868_v52 = vmul.f32 0.25, %v866_v48  ;;  %v835_v59 = vmax.f32 %v827_v50, 0.0  ;;  %v836_v53 = vmax.f32 %v828_v51, 0.0 }
 0x113   : > { %v860_v55 = vmul.f32 %v1353_v32, %v835_v59  ;;  %945 = vmatmul.f32.vlgmr.msrb.gmra.mxu1 %v868_v52  ;;  %v861_v56 = vmul.f32 %v1353_v32, %v836_v53  ;;  %v905_v29 = vrot.slane %v868_v52, 1  ;;  %v984_v61 = vrot.slane %v868_v52, 3 }
 0x114   : > { %v1008_v63 = vrot.slane %v868_v52, 2  ;;  %v1051_v5 = vrot.slane %v868_v52, 4 }
 0x115   : > { %v865_v60 = vadd.f32 %v863_v54, %v860_v55 }
 0x117   : > { %v867_v57 = vadd.f32 %v865_v60, %v861_v56 }
 0x119   : > { %v869_v58 = vmul.f32 0.25, %v867_v57 }
 0x11b   : > { %v906_v30 = vrot.slane %v869_v58, 1  ;;  %v985_v62 = vrot.slane %v869_v58, 3  ;;  %v1009_v0 = vrot.slane %v869_v58, 2  ;;  %v1052_v4 = vrot.slane %v869_v58, 4 }
 0x11d   : > { %v907_v1 = vsel %vm450_vm1, %v905_v29, %v906_v30  ;;  %v986_v2 = vsel %vm983_vm9, %v984_v61, %v985_v62  ;;  %v1010_v3 = vsel %vm705_vm2, %v1008_v63, %v1009_v0  ;;  %v1053_v6 = vsel %vm1050_vm10, %v1051_v5, %v1052_v4 }
 0x11e   : > { %925 = vmatmul.f32.vlgmr.msrb.gmra.mxu0 %v907_v1  ;;  %1004 = vmatmul.f32.vlgmr.msrb.gmra.mxu2 %v986_v2 }
 0x11f   : > { %1028 = vmatmul.f32.vlgmr.msrb.gmra.mxu3 %v1010_v3 }
 0x126   : > { %1071 = vmatmul.f32.vlgmr.msra.gmra.mxu0 %v1053_v6 }
 0x190   : > { %v946_v9 = vpop.f32.mrf.mxu1 }
 0x19b   : > { %v926_v7 = vpop.f32.mrf.mxu0 }
 0x19c   : > { %v947_v25 = vadd.f32 %v946_v9, %v926_v7 }
 0x1a1   : > { %v1005_v8 = vpop.f32.mrf.mxu2 }
 0x1a2   : > { %v1029_v10 = vpop.f32.mrf.mxu3 }
 0x1a3   : > { %v1030_v26 = vadd.f32 %v1029_v10, %v1005_v8  ;;  %v1072_v35 = vpop.f32.mrf.mxu0 }
 0x1a5   : > { %v1032_v11 = vadd.f32 %v1030_v26, %v947_v25 }
 0x1a7   : > { %v1075_v36 = vadd.f32 %v1072_v35, %v1032_v11 }
 0x1a9   : > { %v1080_v13 = vadd.f32 %v1498_v12, %v1075_v36 }
 0x1ab   : > { %v1081_v14 = vmax.f32 %v1080_v13, 0.0 }
 0x1ad   : > { %1091 = vrot.lane.b32.xlu1 %v1081_v14, %s1596_s29  ;;  %1083 = vrot.lane.b32.xlu0 %v1081_v14, %s1597_s30  ;;  %s1115_s29 = sshll.u32 %s1111_s8, 4  ;;  %s1116_s29 = int_to_ptr.hbm [resolvable:$true] %s1115_s29 }
 0x1ae   : > { %s1513_s25 = sshra.s32 %s1116_s29, 4  ;;  %s1514_s25 = int_to_ptr.hbm [resolvable:$true] %s1513_s25 }
 0x1af   : > { %s1515_s30 = scalar_lea.hbm %s1514_s25, 8  ;;  %p1520_p4 = scmp.lt.s32.totalorder %s1514_s25, %s2677_s6 }
 0x1b0   : > { %p1516_p0 = scmp.ne.s32.totalorder %s1514_s25, %s1515_s30  ;;  %p1521_p5 = scmp.lt.s32.totalorder %s1519_s13, %s1515_s30 }
 0x1b2   : > { %p1517_p1 = pnand %p1516_p0, %p1685_p3  ;;  %p1522_p6 = por %p1521_p5, %p1520_p4 }
 0x1b4   : > { %p1518_p2 = pneg %p1517_p1 }
 0x1b5   : > { %1087 = vrot.lane.b32.xlu0 %v1081_v14, %s1598_s12 }
 0x1b6   : > { %p1523_p7 = pnand %p1522_p6, %p1518_p2 }
 0x21f   : > { %v1084_v15 = vpop.permute.xlu0 %1083  ;;  %v1092_v19 = vpop.permute.xlu1 %1091 }
 0x220   : > { %v1086_v16 = vadd.f32 %v1084_v15, %v1081_v14 }
 0x227   : > { %v1088_v17 = vpop.permute.xlu0 %1087 }
 0x228   : > { %v1090_v18 = vadd.f32 %v1088_v17, %v1086_v16 }
 0x22a   : > { %v1094_v20 = vadd.f32 %v1092_v19, %v1090_v18 }
 0x22c   : > { %v1095_v21 = vmul.f32 0.25, %v1094_v20 }
 0x22e   : > { %1097 = vst.msk [vmem:[%s289_s18] sm:$0xff] %vm1096_vm11, %v1095_v21 }
 0x22f   : > { %1526 = shalt.err (!%p1523_p7)
}
 0x230   : > { %1423 = dma.vmem_to_hbm [thread:$0]  (%p1685_p3), %s1114_s14, 128, %s1116_s29, %s1099_s24  }
 0x231 PF: > { %p1429_p9 = scmp.ge.s32.totalorder %s1593_s28, 2  ;;  %s1127_s16 = sand.u32 1, %s1565_s21  }
 0x232   : > { %s1128_s20 = scalar_lea.sflag [#allocation3], %s1127_s16 }
 0x233   : > { %p1426_p10 = pnand %p1429_p9, %p1694_p8 }
 0x235   : > { %p1427_p11 = pneg %p1426_p10 }
 0x237   : > { %1560 = dma.done.wait (%p1427_p11), %s1128_s20, 128  }
 0x238   : > { %1562 = vsyncadd (%p1427_p11), %s1128_s20, 4294967168  ;;  %s19_s28 = sadd.s32 1, %s1593_s28   ;;  %s2684_s10 = sld [smem:[#allocation5_spill]] }
 0x239   : > { %p16_p12 = scmp.ge.s32.totalorder %s19_s28, 6   ;;  %s2685_s9 = sld [smem:[#allocation6_spill]] }
 0x23a   : > { %s2686_s21 = smov %s1569_s22  ;;  %s2687_s22 = smov %s1573_s23 }
 0x23b   : > { %s2688_s23 = smov %s1703_s15  ;;  %s2689_s24 = smov %s1585_s26 }
 0x23c   : > { %s2690_s25 = smov %s1589_s27  ;;  %18 = sbr.rel (!%p16_p12) target bundleno = 5 (0x5), region = 88 }
 0x23e   : > { %s2691_s26 = smov %s2684_s10 }
 0x23f   : > { %s2692_s27 = smov %s2685_s9 }
 0x241   :  { %1134 = vsyncpa [#allocation3], 1 }
 0x242   :  { %1136 = vsyncpa [#allocation3 + $0x1], 1 }

</bundles_post_ra>
